<compile_context>
chip_gen: v5e
topology: v5e:2x2
jax: 0.10.0
libtpu: 0.0.40
codegen_flags: <defaults>
</compile_context>

<pallas_src>
import jax
import jax.numpy as jnp
from jax.experimental import pallas as pl
from jax.experimental.pallas import tpu as pltpu


def encoder_kernel(xcat_ref, len_ref, w_in_ref, b_in_ref, w_rec_ref,
                   w_lin_ref, b_lin_ref,
                   out_ref, hid_ref, cell_ref):
    TB = xcat_ref.shape[0]
    B, H = hid_ref.shape
    T = TB // B
    H2, H6 = 2 * H, 6 * H

    # ---- (1) hoisted input projection: both directions, one MXU matmul ----
    gin = (jnp.dot(xcat_ref[...], w_in_ref[...],
                   preferred_element_type=jnp.float32)
           + b_in_ref[...])                                   # (T*B, 8H)

    lens = len_ref[...]                                       # (B, 1) int32
    w_rec = w_rec_ref[...]                                    # (2H, 8H)

    # Per-step masks (function of lens only -> hoisted above the recurrence).
    # Column layout matches the stacked state [fwd | bwd] over 2H lanes.
    masks = []
    for t in range(T):
        m_f = (t < lens).astype(jnp.float32)                  # (B, 1)
        m_b = ((T - 1 - t) < lens).astype(jnp.float32)        # (B, 1)
        masks.append(jnp.concatenate(
            [jnp.broadcast_to(m_f, (B, H)),
             jnp.broadcast_to(m_b, (B, H))], axis=1))         # (B, 2H)

    h = jnp.zeros((B, H2), jnp.float32)                       # [h_fwd | h_bwd]
    c = jnp.zeros((B, H2), jnp.float32)                       # [c_fwd | c_bwd]
    y_f = [None] * T
    y_b = [None] * T

    # ---- (2) fused fwd/bwd recurrence, fully unrolled (T small & static) ---
    # (for large T switch to lax.fori_loop(..., unroll=k))
    for t in range(T):
        gates = gin[t * B:(t + 1) * B, :] + jnp.dot(
            h, w_rec, preferred_element_type=jnp.float32)     # (B, 8H)
        sig = jax.nn.sigmoid(gates[:, :H6])   # [i_f i_b f_f f_b o_f o_b]
        g = jnp.tanh(gates[:, H6:])           # [g_f g_b]
        i_g = sig[:, 0 * H2:1 * H2]
        f_g = sig[:, 1 * H2:2 * H2]
        o_g = sig[:, 2 * H2:3 * H2]
        c_new = f_g * c + i_g * g
        h_new = o_g * jnp.tanh(c_new)

        # packed-sequence semantics: zero outputs at padded positions,
        # carry the state past each sequence's length.
        m = masks[t]
        y = m * h_new                                         # (B, 2H)
        y_f[t] = y[:, :H]                                     # fwd output @ time t
        y_b[T - 1 - t] = y[:, H:]                             # bwd output @ time T-1-t
        h = h + m * (h_new - h)
        c = c + m * (c_new - c)

    # hidden = (hidden_fwd + hidden_bwd) / 2 ; cell likewise
    hid_ref[...] = (h[:, :H] + h[:, H:]) * 0.5
    cell_ref[...] = (c[:, :H] + c[:, H:]) * 0.5

    # ---- (3) output Linear over all (t, b) positions: one K=2H matmul ------
    y_all = jnp.concatenate(
        [jnp.concatenate(y_f, axis=0),
         jnp.concatenate(y_b, axis=0)], axis=1)               # (T*B, 2H)
    out_ref[...] = (jnp.dot(y_all, w_lin_ref[...],
                            preferred_element_type=jnp.float32)
                    + b_lin_ref[...])


def init_params(key, input_dim, emb_dim, hid_dim):
    H, E = hid_dim, emb_dim
    ks = jax.random.split(key, 11)
    s = 1.0 / float(H) ** 0.5

    def u(k, shape):
        return jax.random.uniform(k, shape, jnp.float32, -s, s)

    emb = jax.random.normal(ks[0], (input_dim, E), jnp.float32)

    # Per-direction LSTM weights, gate order [i | f | o | g] along the 4H axis
    # (sigmoid gates contiguous, tanh gate last).  When importing real PyTorch
    # weights, reorder rows from PyTorch's [i, f, g, o] to [i, f, o, g].
    wih_f = u(ks[1], (4 * H, E)); whh_f = u(ks[2], (4 * H, H))
    b_f = u(ks[3], (4 * H,)) + u(ks[4], (4 * H,))             # b_ih + b_hh
    wih_b = u(ks[5], (4 * H, E)); whh_b = u(ks[6], (4 * H, H))
    b_b = u(ks[7], (4 * H,)) + u(ks[8], (4 * H,))
    wlin = u(ks[9], (H, 2 * H))                               # nn.Linear(2H, H)
    blin = u(ks[10], (H,))

    def interleave(a_fwd, a_bwd):
        # (R, 4H) fwd / bwd, gate order [i f o g] -> (R, 8H) with per-gate
        # direction-interleaved columns [i_f i_b f_f f_b o_f o_b g_f g_b].
        blocks = []
        for k in range(4):
            blocks.append(a_fwd[:, k * H:(k + 1) * H])
            blocks.append(a_bwd[:, k * H:(k + 1) * H])
        return jnp.concatenate(blocks, axis=1)

    zE = jnp.zeros((E, 4 * H), jnp.float32)
    zH = jnp.zeros((H, 4 * H), jnp.float32)
    # Direction-block-diagonal weights with interleaved gate columns:
    #   rows [:E]/[:H] feed the forward gates, rows [E:]/[H:] the backward gates.
    w_in = jnp.concatenate([interleave(wih_f.T, zE),
                            interleave(zE, wih_b.T)], axis=0)   # (2E, 8H)
    w_rec = jnp.concatenate([interleave(whh_f.T, zH),
                             interleave(zH, whh_b.T)], axis=0)  # (2H, 8H)
    b_in = interleave(b_f[None, :], b_b[None, :])               # (1, 8H)

    return {
        "emb": emb,
        "w_in": w_in, "b_in": b_in, "w_rec": w_rec,
        "w_lin": wlin.T,            # (2H, H): rows [:H] hit y_fwd, [H:] y_bwd
        "b_lin": blin[None, :],     # (1, H)
    }


def encoder_forward(params, src, src_len):
    B, T = src.shape
    H = params["b_lin"].shape[1]
    E = params["emb"].shape[1]

    # Embedding lookup (plain JAX glue); dropout applied as identity.
    # TODO(synk): training-mode nn.Dropout RNG mask not reproduced (eval-mode identity).
    embedded = params["emb"][src]                        # (B, T, E)
    emb_tm = jnp.transpose(embedded, (1, 0, 2))          # (T, B, E) time-major
    emb_rev = emb_tm[::-1]                               # time-reversed (bwd dir)
    x_cat = jnp.concatenate([emb_tm, emb_rev], axis=-1).reshape(T * B, 2 * E)
    lens = src_len.astype(jnp.int32).reshape(B, 1)       # (B, 1)

    vmem = pl.BlockSpec(memory_space=pltpu.MemorySpace.VMEM)

    # Toy sizes: everything fits comfortably in VMEM, gridless.
    # TODO(synk): for production T/B/H on v7x (64 MiB VMEM / 2 TCs) add a
    # batch-parallel grid with BlockSpec tiling.
    out_flat, hidden, cell = pl.pallas_call(
        encoder_kernel,
        out_shape=(
            jax.ShapeDtypeStruct((T * B, H), jnp.float32),
            jax.ShapeDtypeStruct((B, H), jnp.float32),
            jax.ShapeDtypeStruct((B, H), jnp.float32),
        ),
        in_specs=[vmem] * 7,
        out_specs=(vmem, vmem, vmem),
    )(x_cat, lens, params["w_in"], params["b_in"], params["w_rec"],
      params["w_lin"], params["b_lin"])

    outputs = jnp.transpose(out_flat.reshape(T, B, H), (1, 0, 2))  # (B, T, H)
    # pad_packed_sequence trims to max(src_len); we return the full padded
    # length (padded positions = linear bias over zeroed LSTM outputs) to stay
    # jittable and avoid a device->host sync.  Caller may slice if needed.
    return outputs, hidden, cell


if __name__ == "__main__":
    key = jax.random.PRNGKey(0)
    INPUT_DIM, EMB_DIM, HID_DIM = 50, 32, 32
    B, T = 2, 8

    kp, ksrc = jax.random.split(key)
    params = init_params(kp, INPUT_DIM, EMB_DIM, HID_DIM)
    src = jax.random.randint(ksrc, (B, T), 0, INPUT_DIM, dtype=jnp.int32)
    src_len = jnp.array([T, 5], dtype=jnp.int32)  # unsorted ok (enforce_sorted=False)

    fwd = jax.jit(encoder_forward)
    outputs, hidden, cell = fwd(params, src, src_len)
    jax.block_until_ready((outputs, hidden, cell))

    assert outputs.shape == (B, T, HID_DIM)
    assert hidden.shape == (B, HID_DIM)
    assert cell.shape == (B, HID_DIM)
    print("KERNEL_OK")
</pallas_src>

<mosaic_0001>
module attributes {stable_mosaic.version = 11 : i64} {
  func.func @encoder_kernel(%arg0: memref<16x64xf32, #tpu.memory_space<vmem>>, %arg1: memref<2x1xi32, #tpu.memory_space<vmem>>, %arg2: memref<64x256xf32, #tpu.memory_space<vmem>>, %arg3: memref<1x256xf32, #tpu.memory_space<vmem>>, %arg4: memref<64x256xf32, #tpu.memory_space<vmem>>, %arg5: memref<64x32xf32, #tpu.memory_space<vmem>>, %arg6: memref<1x32xf32, #tpu.memory_space<vmem>>, %arg7: memref<16x32xf32, #tpu.memory_space<vmem>>, %arg8: memref<2x32xf32, #tpu.memory_space<vmem>>, %arg9: memref<2x32xf32, #tpu.memory_space<vmem>>) attributes {dimension_semantics = [], scalar_prefetch = 0 : i64, scratch_operands = 0 : i64, tpu.core_type = #tpu.core_type<tc>} {
    %c0 = arith.constant 0 : index
    %c0_0 = arith.constant 0 : index
    %0 = vector.load %arg0[%c0, %c0_0] : memref<16x64xf32, #tpu.memory_space<vmem>>, vector<16x64xf32>
    %c0_1 = arith.constant 0 : index
    %c0_2 = arith.constant 0 : index
    %1 = vector.load %arg2[%c0_1, %c0_2] : memref<64x256xf32, #tpu.memory_space<vmem>>, vector<64x256xf32>
    %cst = arith.constant dense<0.000000e+00> : vector<16x256xf32>
    %2 = tpu.matmul %0, %1, %cst {dimension_numbers = #tpu.dot_dimension_numbers<[1], [0], [0], [1], [0, 0, 1, 1], [], []>} : vector<16x64xf32>, vector<64x256xf32>, vector<16x256xf32> -> vector<16x256xf32>
    %c0_3 = arith.constant 0 : index
    %c0_4 = arith.constant 0 : index
    %3 = vector.load %arg3[%c0_3, %c0_4] : memref<1x256xf32, #tpu.memory_space<vmem>>, vector<1x256xf32>
    %4 = vector.broadcast %3 : vector<1x256xf32> to vector<16x256xf32>
    %5 = arith.addf %2, %4 : vector<16x256xf32>
    %c0_5 = arith.constant 0 : index
    %c0_6 = arith.constant 0 : index
    %6 = vector.load %arg1[%c0_5, %c0_6] : memref<2x1xi32, #tpu.memory_space<vmem>>, vector<2x1xi32>
    %c0_7 = arith.constant 0 : index
    %c0_8 = arith.constant 0 : index
    %7 = vector.load %arg4[%c0_7, %c0_8] : memref<64x256xf32, #tpu.memory_space<vmem>>, vector<64x256xf32>
    %c0_i32 = arith.constant 0 : i32
    %8 = vector.broadcast %c0_i32 : i32 to vector<2x1xi32>
    %9 = arith.cmpi sgt, %6, %8 : vector<2x1xi32>
    %10 = arith.extui %9 : vector<2x1xi1> to vector<2x1xi32>
    %11 = arith.sitofp %10 : vector<2x1xi32> to vector<2x1xf32>
    %c7_i32 = arith.constant 7 : i32
    %12 = vector.broadcast %c7_i32 : i32 to vector<2x1xi32>
    %13 = arith.cmpi sgt, %6, %12 : vector<2x1xi32>
    %14 = arith.extui %13 : vector<2x1xi1> to vector<2x1xi32>
    %15 = arith.sitofp %14 : vector<2x1xi32> to vector<2x1xf32>
    %16 = vector.shape_cast %11 : vector<2x1xf32> to vector<2x1xf32>
    %17 = vector.broadcast %16 : vector<2x1xf32> to vector<2x32xf32>
    %18 = vector.shape_cast %15 : vector<2x1xf32> to vector<2x1xf32>
    %19 = vector.broadcast %18 : vector<2x1xf32> to vector<2x32xf32>
    %20 = tpu.concatenate %17, %19 in 1 : vector<2x32xf32>, vector<2x32xf32> -> vector<2x64xf32>
    %c1_i32 = arith.constant 1 : i32
    %21 = vector.broadcast %c1_i32 : i32 to vector<2x1xi32>
    %22 = arith.cmpi sgt, %6, %21 : vector<2x1xi32>
    %23 = arith.extui %22 : vector<2x1xi1> to vector<2x1xi32>
    %24 = arith.sitofp %23 : vector<2x1xi32> to vector<2x1xf32>
    %c6_i32 = arith.constant 6 : i32
    %25 = vector.broadcast %c6_i32 : i32 to vector<2x1xi32>
    %26 = arith.cmpi sgt, %6, %25 : vector<2x1xi32>
    %27 = arith.extui %26 : vector<2x1xi1> to vector<2x1xi32>
    %28 = arith.sitofp %27 : vector<2x1xi32> to vector<2x1xf32>
    %29 = vector.shape_cast %24 : vector<2x1xf32> to vector<2x1xf32>
    %30 = vector.broadcast %29 : vector<2x1xf32> to vector<2x32xf32>
    %31 = vector.shape_cast %28 : vector<2x1xf32> to vector<2x1xf32>
    %32 = vector.broadcast %31 : vector<2x1xf32> to vector<2x32xf32>
    %33 = tpu.concatenate %30, %32 in 1 : vector<2x32xf32>, vector<2x32xf32> -> vector<2x64xf32>
    %c2_i32 = arith.constant 2 : i32
    %34 = vector.broadcast %c2_i32 : i32 to vector<2x1xi32>
    %35 = arith.cmpi sgt, %6, %34 : vector<2x1xi32>
    %36 = arith.extui %35 : vector<2x1xi1> to vector<2x1xi32>
    %37 = arith.sitofp %36 : vector<2x1xi32> to vector<2x1xf32>
    %c5_i32 = arith.constant 5 : i32
    %38 = vector.broadcast %c5_i32 : i32 to vector<2x1xi32>
    %39 = arith.cmpi sgt, %6, %38 : vector<2x1xi32>
    %40 = arith.extui %39 : vector<2x1xi1> to vector<2x1xi32>
    %41 = arith.sitofp %40 : vector<2x1xi32> to vector<2x1xf32>
    %42 = vector.shape_cast %37 : vector<2x1xf32> to vector<2x1xf32>
    %43 = vector.broadcast %42 : vector<2x1xf32> to vector<2x32xf32>
    %44 = vector.shape_cast %41 : vector<2x1xf32> to vector<2x1xf32>
    %45 = vector.broadcast %44 : vector<2x1xf32> to vector<2x32xf32>
    %46 = tpu.concatenate %43, %45 in 1 : vector<2x32xf32>, vector<2x32xf32> -> vector<2x64xf32>
    %c3_i32 = arith.constant 3 : i32
    %47 = vector.broadcast %c3_i32 : i32 to vector<2x1xi32>
    %48 = arith.cmpi sgt, %6, %47 : vector<2x1xi32>
    %49 = arith.extui %48 : vector<2x1xi1> to vector<2x1xi32>
    %50 = arith.sitofp %49 : vector<2x1xi32> to vector<2x1xf32>
    %c4_i32 = arith.constant 4 : i32
    %51 = vector.broadcast %c4_i32 : i32 to vector<2x1xi32>
    %52 = arith.cmpi sgt, %6, %51 : vector<2x1xi32>
    %53 = arith.extui %52 : vector<2x1xi1> to vector<2x1xi32>
    %54 = arith.sitofp %53 : vector<2x1xi32> to vector<2x1xf32>
    %55 = vector.shape_cast %50 : vector<2x1xf32> to vector<2x1xf32>
    %56 = vector.broadcast %55 : vector<2x1xf32> to vector<2x32xf32>
    %57 = vector.shape_cast %54 : vector<2x1xf32> to vector<2x1xf32>
    %58 = vector.broadcast %57 : vector<2x1xf32> to vector<2x32xf32>
    %59 = tpu.concatenate %56, %58 in 1 : vector<2x32xf32>, vector<2x32xf32> -> vector<2x64xf32>
    %c4_i32_9 = arith.constant 4 : i32
    %60 = vector.broadcast %c4_i32_9 : i32 to vector<2x1xi32>
    %61 = arith.cmpi sgt, %6, %60 : vector<2x1xi32>
    %62 = arith.extui %61 : vector<2x1xi1> to vector<2x1xi32>
    %63 = arith.sitofp %62 : vector<2x1xi32> to vector<2x1xf32>
    %c3_i32_10 = arith.constant 3 : i32
    %64 = vector.broadcast %c3_i32_10 : i32 to vector<2x1xi32>
    %65 = arith.cmpi sgt, %6, %64 : vector<2x1xi32>
    %66 = arith.extui %65 : vector<2x1xi1> to vector<2x1xi32>
    %67 = arith.sitofp %66 : vector<2x1xi32> to vector<2x1xf32>
    %68 = vector.shape_cast %63 : vector<2x1xf32> to vector<2x1xf32>
    %69 = vector.broadcast %68 : vector<2x1xf32> to vector<2x32xf32>
    %70 = vector.shape_cast %67 : vector<2x1xf32> to vector<2x1xf32>
    %71 = vector.broadcast %70 : vector<2x1xf32> to vector<2x32xf32>
    %72 = tpu.concatenate %69, %71 in 1 : vector<2x32xf32>, vector<2x32xf32> -> vector<2x64xf32>
    %c5_i32_11 = arith.constant 5 : i32
    %73 = vector.broadcast %c5_i32_11 : i32 to vector<2x1xi32>
    %74 = arith.cmpi sgt, %6, %73 : vector<2x1xi32>
    %75 = arith.extui %74 : vector<2x1xi1> to vector<2x1xi32>
    %76 = arith.sitofp %75 : vector<2x1xi32> to vector<2x1xf32>
    %c2_i32_12 = arith.constant 2 : i32
    %77 = vector.broadcast %c2_i32_12 : i32 to vector<2x1xi32>
    %78 = arith.cmpi sgt, %6, %77 : vector<2x1xi32>
    %79 = arith.extui %78 : vector<2x1xi1> to vector<2x1xi32>
    %80 = arith.sitofp %79 : vector<2x1xi32> to vector<2x1xf32>
    %81 = vector.shape_cast %76 : vector<2x1xf32> to vector<2x1xf32>
    %82 = vector.broadcast %81 : vector<2x1xf32> to vector<2x32xf32>
    %83 = vector.shape_cast %80 : vector<2x1xf32> to vector<2x1xf32>
    %84 = vector.broadcast %83 : vector<2x1xf32> to vector<2x32xf32>
    %85 = tpu.concatenate %82, %84 in 1 : vector<2x32xf32>, vector<2x32xf32> -> vector<2x64xf32>
    %c6_i32_13 = arith.constant 6 : i32
    %86 = vector.broadcast %c6_i32_13 : i32 to vector<2x1xi32>
    %87 = arith.cmpi sgt, %6, %86 : vector<2x1xi32>
    %88 = arith.extui %87 : vector<2x1xi1> to vector<2x1xi32>
    %89 = arith.sitofp %88 : vector<2x1xi32> to vector<2x1xf32>
    %c1_i32_14 = arith.constant 1 : i32
    %90 = vector.broadcast %c1_i32_14 : i32 to vector<2x1xi32>
    %91 = arith.cmpi sgt, %6, %90 : vector<2x1xi32>
    %92 = arith.extui %91 : vector<2x1xi1> to vector<2x1xi32>
    %93 = arith.sitofp %92 : vector<2x1xi32> to vector<2x1xf32>
    %94 = vector.shape_cast %89 : vector<2x1xf32> to vector<2x1xf32>
    %95 = vector.broadcast %94 : vector<2x1xf32> to vector<2x32xf32>
    %96 = vector.shape_cast %93 : vector<2x1xf32> to vector<2x1xf32>
    %97 = vector.broadcast %96 : vector<2x1xf32> to vector<2x32xf32>
    %98 = tpu.concatenate %95, %97 in 1 : vector<2x32xf32>, vector<2x32xf32> -> vector<2x64xf32>
    %c7_i32_15 = arith.constant 7 : i32
    %99 = vector.broadcast %c7_i32_15 : i32 to vector<2x1xi32>
    %100 = arith.cmpi sgt, %6, %99 : vector<2x1xi32>
    %101 = arith.extui %100 : vector<2x1xi1> to vector<2x1xi32>
    %102 = arith.sitofp %101 : vector<2x1xi32> to vector<2x1xf32>
    %c0_i32_16 = arith.constant 0 : i32
    %103 = vector.broadcast %c0_i32_16 : i32 to vector<2x1xi32>
    %104 = arith.cmpi sgt, %6, %103 : vector<2x1xi32>
    %105 = arith.extui %104 : vector<2x1xi1> to vector<2x1xi32>
    %106 = arith.sitofp %105 : vector<2x1xi32> to vector<2x1xf32>
    %107 = vector.shape_cast %102 : vector<2x1xf32> to vector<2x1xf32>
    %108 = vector.broadcast %107 : vector<2x1xf32> to vector<2x32xf32>
    %109 = vector.shape_cast %106 : vector<2x1xf32> to vector<2x1xf32>
    %110 = vector.broadcast %109 : vector<2x1xf32> to vector<2x32xf32>
    %111 = tpu.concatenate %108, %110 in 1 : vector<2x32xf32>, vector<2x32xf32> -> vector<2x64xf32>
    %cst_17 = arith.constant 0.000000e+00 : f32
    %112 = vector.broadcast %cst_17 : f32 to vector<2x64xf32>
    %cst_18 = arith.constant 0.000000e+00 : f32
    %113 = vector.broadcast %cst_18 : f32 to vector<2x64xf32>
    %114 = vector.extract_strided_slice %5 {offsets = [0, 0], sizes = [2, 256], strides = [1, 1]} : vector<16x256xf32> to vector<2x256xf32>
    %cst_19 = arith.constant dense<0.000000e+00> : vector<2x256xf32>
    %115 = tpu.matmul %112, %7, %cst_19 {dimension_numbers = #tpu.dot_dimension_numbers<[1], [0], [0], [1], [0, 0, 1, 1], [], []>} : vector<2x64xf32>, vector<64x256xf32>, vector<2x256xf32> -> vector<2x256xf32>
    %116 = arith.addf %114, %115 : vector<2x256xf32>
    %117 = vector.extract_strided_slice %116 {offsets = [0, 0], sizes = [2, 192], strides = [1, 1]} : vector<2x256xf32> to vector<2x192xf32>
    %118 = arith.negf %117 : vector<2x192xf32>
    %119 = math.exp %118 : vector<2x192xf32>
    %cst_20 = arith.constant 1.000000e+00 : f32
    %120 = vector.broadcast %cst_20 : f32 to vector<2x192xf32>
    %121 = arith.addf %120, %119 : vector<2x192xf32>
    %122 = arith.divf %120, %121 : vector<2x192xf32>
    %123 = vector.extract_strided_slice %116 {offsets = [0, 192], sizes = [2, 64], strides = [1, 1]} : vector<2x256xf32> to vector<2x64xf32>
    %124 = math.tanh %123 : vector<2x64xf32>
    %125 = vector.extract_strided_slice %122 {offsets = [0, 0], sizes = [2, 64], strides = [1, 1]} : vector<2x192xf32> to vector<2x64xf32>
    %126 = vector.extract_strided_slice %122 {offsets = [0, 64], sizes = [2, 64], strides = [1, 1]} : vector<2x192xf32> to vector<2x64xf32>
    %127 = vector.extract_strided_slice %122 {offsets = [0, 128], sizes = [2, 64], strides = [1, 1]} : vector<2x192xf32> to vector<2x64xf32>
    %128 = arith.mulf %126, %113 : vector<2x64xf32>
    %129 = arith.mulf %125, %124 : vector<2x64xf32>
    %130 = arith.addf %128, %129 : vector<2x64xf32>
    %131 = math.tanh %130 : vector<2x64xf32>
    %132 = arith.mulf %127, %131 : vector<2x64xf32>
    %133 = arith.mulf %20, %132 : vector<2x64xf32>
    %134 = vector.extract_strided_slice %133 {offsets = [0, 0], sizes = [2, 32], strides = [1, 1]} : vector<2x64xf32> to vector<2x32xf32>
    %135 = vector.extract_strided_slice %133 {offsets = [0, 32], sizes = [2, 32], strides = [1, 1]} : vector<2x64xf32> to vector<2x32xf32>
    %136 = arith.subf %132, %112 : vector<2x64xf32>
    %137 = arith.mulf %20, %136 : vector<2x64xf32>
    %138 = arith.addf %112, %137 : vector<2x64xf32>
    %139 = arith.subf %130, %113 : vector<2x64xf32>
    %140 = arith.mulf %20, %139 : vector<2x64xf32>
    %141 = arith.addf %113, %140 : vector<2x64xf32>
    %142 = vector.extract_strided_slice %5 {offsets = [2, 0], sizes = [2, 256], strides = [1, 1]} : vector<16x256xf32> to vector<2x256xf32>
    %cst_21 = arith.constant dense<0.000000e+00> : vector<2x256xf32>
    %143 = tpu.matmul %138, %7, %cst_21 {dimension_numbers = #tpu.dot_dimension_numbers<[1], [0], [0], [1], [0, 0, 1, 1], [], []>} : vector<2x64xf32>, vector<64x256xf32>, vector<2x256xf32> -> vector<2x256xf32>
    %144 = arith.addf %142, %143 : vector<2x256xf32>
    %145 = vector.extract_strided_slice %144 {offsets = [0, 0], sizes = [2, 192], strides = [1, 1]} : vector<2x256xf32> to vector<2x192xf32>
    %146 = arith.negf %145 : vector<2x192xf32>
    %147 = math.exp %146 : vector<2x192xf32>
    %cst_22 = arith.constant 1.000000e+00 : f32
    %148 = vector.broadcast %cst_22 : f32 to vector<2x192xf32>
    %149 = arith.addf %148, %147 : vector<2x192xf32>
    %150 = arith.divf %148, %149 : vector<2x192xf32>
    %151 = vector.extract_strided_slice %144 {offsets = [0, 192], sizes = [2, 64], strides = [1, 1]} : vector<2x256xf32> to vector<2x64xf32>
    %152 = math.tanh %151 : vector<2x64xf32>
    %153 = vector.extract_strided_slice %150 {offsets = [0, 0], sizes = [2, 64], strides = [1, 1]} : vector<2x192xf32> to vector<2x64xf32>
    %154 = vector.extract_strided_slice %150 {offsets = [0, 64], sizes = [2, 64], strides = [1, 1]} : vector<2x192xf32> to vector<2x64xf32>
    %155 = vector.extract_strided_slice %150 {offsets = [0, 128], sizes = [2, 64], strides = [1, 1]} : vector<2x192xf32> to vector<2x64xf32>
    %156 = arith.mulf %154, %141 : vector<2x64xf32>
    %157 = arith.mulf %153, %152 : vector<2x64xf32>
    %158 = arith.addf %156, %157 : vector<2x64xf32>
    %159 = math.tanh %158 : vector<2x64xf32>
    %160 = arith.mulf %155, %159 : vector<2x64xf32>
    %161 = arith.mulf %33, %160 : vector<2x64xf32>
    %162 = vector.extract_strided_slice %161 {offsets = [0, 0], sizes = [2, 32], strides = [1, 1]} : vector<2x64xf32> to vector<2x32xf32>
    %163 = vector.extract_strided_slice %161 {offsets = [0, 32], sizes = [2, 32], strides = [1, 1]} : vector<2x64xf32> to vector<2x32xf32>
    %164 = arith.subf %160, %138 : vector<2x64xf32>
    %165 = arith.mulf %33, %164 : vector<2x64xf32>
    %166 = arith.addf %138, %165 : vector<2x64xf32>
    %167 = arith.subf %158, %141 : vector<2x64xf32>
    %168 = arith.mulf %33, %167 : vector<2x64xf32>
    %169 = arith.addf %141, %168 : vector<2x64xf32>
    %170 = vector.extract_strided_slice %5 {offsets = [4, 0], sizes = [2, 256], strides = [1, 1]} : vector<16x256xf32> to vector<2x256xf32>
    %cst_23 = arith.constant dense<0.000000e+00> : vector<2x256xf32>
    %171 = tpu.matmul %166, %7, %cst_23 {dimension_numbers = #tpu.dot_dimension_numbers<[1], [0], [0], [1], [0, 0, 1, 1], [], []>} : vector<2x64xf32>, vector<64x256xf32>, vector<2x256xf32> -> vector<2x256xf32>
    %172 = arith.addf %170, %171 : vector<2x256xf32>
    %173 = vector.extract_strided_slice %172 {offsets = [0, 0], sizes = [2, 192], strides = [1, 1]} : vector<2x256xf32> to vector<2x192xf32>
    %174 = arith.negf %173 : vector<2x192xf32>
    %175 = math.exp %174 : vector<2x192xf32>
    %cst_24 = arith.constant 1.000000e+00 : f32
    %176 = vector.broadcast %cst_24 : f32 to vector<2x192xf32>
    %177 = arith.addf %176, %175 : vector<2x192xf32>
    %178 = arith.divf %176, %177 : vector<2x192xf32>
    %179 = vector.extract_strided_slice %172 {offsets = [0, 192], sizes = [2, 64], strides = [1, 1]} : vector<2x256xf32> to vector<2x64xf32>
    %180 = math.tanh %179 : vector<2x64xf32>
    %181 = vector.extract_strided_slice %178 {offsets = [0, 0], sizes = [2, 64], strides = [1, 1]} : vector<2x192xf32> to vector<2x64xf32>
    %182 = vector.extract_strided_slice %178 {offsets = [0, 64], sizes = [2, 64], strides = [1, 1]} : vector<2x192xf32> to vector<2x64xf32>
    %183 = vector.extract_strided_slice %178 {offsets = [0, 128], sizes = [2, 64], strides = [1, 1]} : vector<2x192xf32> to vector<2x64xf32>
    %184 = arith.mulf %182, %169 : vector<2x64xf32>
    %185 = arith.mulf %181, %180 : vector<2x64xf32>
    %186 = arith.addf %184, %185 : vector<2x64xf32>
    %187 = math.tanh %186 : vector<2x64xf32>
    %188 = arith.mulf %183, %187 : vector<2x64xf32>
    %189 = arith.mulf %46, %188 : vector<2x64xf32>
    %190 = vector.extract_strided_slice %189 {offsets = [0, 0], sizes = [2, 32], strides = [1, 1]} : vector<2x64xf32> to vector<2x32xf32>
    %191 = vector.extract_strided_slice %189 {offsets = [0, 32], sizes = [2, 32], strides = [1, 1]} : vector<2x64xf32> to vector<2x32xf32>
    %192 = arith.subf %188, %166 : vector<2x64xf32>
    %193 = arith.mulf %46, %192 : vector<2x64xf32>
    %194 = arith.addf %166, %193 : vector<2x64xf32>
    %195 = arith.subf %186, %169 : vector<2x64xf32>
    %196 = arith.mulf %46, %195 : vector<2x64xf32>
    %197 = arith.addf %169, %196 : vector<2x64xf32>
    %198 = vector.extract_strided_slice %5 {offsets = [6, 0], sizes = [2, 256], strides = [1, 1]} : vector<16x256xf32> to vector<2x256xf32>
    %cst_25 = arith.constant dense<0.000000e+00> : vector<2x256xf32>
    %199 = tpu.matmul %194, %7, %cst_25 {dimension_numbers = #tpu.dot_dimension_numbers<[1], [0], [0], [1], [0, 0, 1, 1], [], []>} : vector<2x64xf32>, vector<64x256xf32>, vector<2x256xf32> -> vector<2x256xf32>
    %200 = arith.addf %198, %199 : vector<2x256xf32>
    %201 = vector.extract_strided_slice %200 {offsets = [0, 0], sizes = [2, 192], strides = [1, 1]} : vector<2x256xf32> to vector<2x192xf32>
    %202 = arith.negf %201 : vector<2x192xf32>
    %203 = math.exp %202 : vector<2x192xf32>
    %cst_26 = arith.constant 1.000000e+00 : f32
    %204 = vector.broadcast %cst_26 : f32 to vector<2x192xf32>
    %205 = arith.addf %204, %203 : vector<2x192xf32>
    %206 = arith.divf %204, %205 : vector<2x192xf32>
    %207 = vector.extract_strided_slice %200 {offsets = [0, 192], sizes = [2, 64], strides = [1, 1]} : vector<2x256xf32> to vector<2x64xf32>
    %208 = math.tanh %207 : vector<2x64xf32>
    %209 = vector.extract_strided_slice %206 {offsets = [0, 0], sizes = [2, 64], strides = [1, 1]} : vector<2x192xf32> to vector<2x64xf32>
    %210 = vector.extract_strided_slice %206 {offsets = [0, 64], sizes = [2, 64], strides = [1, 1]} : vector<2x192xf32> to vector<2x64xf32>
    %211 = vector.extract_strided_slice %206 {offsets = [0, 128], sizes = [2, 64], strides = [1, 1]} : vector<2x192xf32> to vector<2x64xf32>
    %212 = arith.mulf %210, %197 : vector<2x64xf32>
    %213 = arith.mulf %209, %208 : vector<2x64xf32>
    %214 = arith.addf %212, %213 : vector<2x64xf32>
    %215 = math.tanh %214 : vector<2x64xf32>
    %216 = arith.mulf %211, %215 : vector<2x64xf32>
    %217 = arith.mulf %59, %216 : vector<2x64xf32>
    %218 = vector.extract_strided_slice %217 {offsets = [0, 0], sizes = [2, 32], strides = [1, 1]} : vector<2x64xf32> to vector<2x32xf32>
    %219 = vector.extract_strided_slice %217 {offsets = [0, 32], sizes = [2, 32], strides = [1, 1]} : vector<2x64xf32> to vector<2x32xf32>
    %220 = arith.subf %216, %194 : vector<2x64xf32>
    %221 = arith.mulf %59, %220 : vector<2x64xf32>
    %222 = arith.addf %194, %221 : vector<2x64xf32>
    %223 = arith.subf %214, %197 : vector<2x64xf32>
    %224 = arith.mulf %59, %223 : vector<2x64xf32>
    %225 = arith.addf %197, %224 : vector<2x64xf32>
    %226 = vector.extract_strided_slice %5 {offsets = [8, 0], sizes = [2, 256], strides = [1, 1]} : vector<16x256xf32> to vector<2x256xf32>
    %cst_27 = arith.constant dense<0.000000e+00> : vector<2x256xf32>
    %227 = tpu.matmul %222, %7, %cst_27 {dimension_numbers = #tpu.dot_dimension_numbers<[1], [0], [0], [1], [0, 0, 1, 1], [], []>} : vector<2x64xf32>, vector<64x256xf32>, vector<2x256xf32> -> vector<2x256xf32>
    %228 = arith.addf %226, %227 : vector<2x256xf32>
    %229 = vector.extract_strided_slice %228 {offsets = [0, 0], sizes = [2, 192], strides = [1, 1]} : vector<2x256xf32> to vector<2x192xf32>
    %230 = arith.negf %229 : vector<2x192xf32>
    %231 = math.exp %230 : vector<2x192xf32>
    %cst_28 = arith.constant 1.000000e+00 : f32
    %232 = vector.broadcast %cst_28 : f32 to vector<2x192xf32>
    %233 = arith.addf %232, %231 : vector<2x192xf32>
    %234 = arith.divf %232, %233 : vector<2x192xf32>
    %235 = vector.extract_strided_slice %228 {offsets = [0, 192], sizes = [2, 64], strides = [1, 1]} : vector<2x256xf32> to vector<2x64xf32>
    %236 = math.tanh %235 : vector<2x64xf32>
    %237 = vector.extract_strided_slice %234 {offsets = [0, 0], sizes = [2, 64], strides = [1, 1]} : vector<2x192xf32> to vector<2x64xf32>
    %238 = vector.extract_strided_slice %234 {offsets = [0, 64], sizes = [2, 64], strides = [1, 1]} : vector<2x192xf32> to vector<2x64xf32>
    %239 = vector.extract_strided_slice %234 {offsets = [0, 128], sizes = [2, 64], strides = [1, 1]} : vector<2x192xf32> to vector<2x64xf32>
    %240 = arith.mulf %238, %225 : vector<2x64xf32>
    %241 = arith.mulf %237, %236 : vector<2x64xf32>
    %242 = arith.addf %240, %241 : vector<2x64xf32>
    %243 = math.tanh %242 : vector<2x64xf32>
    %244 = arith.mulf %239, %243 : vector<2x64xf32>
    %245 = arith.mulf %72, %244 : vector<2x64xf32>
    %246 = vector.extract_strided_slice %245 {offsets = [0, 0], sizes = [2, 32], strides = [1, 1]} : vector<2x64xf32> to vector<2x32xf32>
    %247 = vector.extract_strided_slice %245 {offsets = [0, 32], sizes = [2, 32], strides = [1, 1]} : vector<2x64xf32> to vector<2x32xf32>
    %248 = arith.subf %244, %222 : vector<2x64xf32>
    %249 = arith.mulf %72, %248 : vector<2x64xf32>
    %250 = arith.addf %222, %249 : vector<2x64xf32>
    %251 = arith.subf %242, %225 : vector<2x64xf32>
    %252 = arith.mulf %72, %251 : vector<2x64xf32>
    %253 = arith.addf %225, %252 : vector<2x64xf32>
    %254 = vector.extract_strided_slice %5 {offsets = [10, 0], sizes = [2, 256], strides = [1, 1]} : vector<16x256xf32> to vector<2x256xf32>
    %cst_29 = arith.constant dense<0.000000e+00> : vector<2x256xf32>
    %255 = tpu.matmul %250, %7, %cst_29 {dimension_numbers = #tpu.dot_dimension_numbers<[1], [0], [0], [1], [0, 0, 1, 1], [], []>} : vector<2x64xf32>, vector<64x256xf32>, vector<2x256xf32> -> vector<2x256xf32>
    %256 = arith.addf %254, %255 : vector<2x256xf32>
    %257 = vector.extract_strided_slice %256 {offsets = [0, 0], sizes = [2, 192], strides = [1, 1]} : vector<2x256xf32> to vector<2x192xf32>
    %258 = arith.negf %257 : vector<2x192xf32>
    %259 = math.exp %258 : vector<2x192xf32>
    %cst_30 = arith.constant 1.000000e+00 : f32
    %260 = vector.broadcast %cst_30 : f32 to vector<2x192xf32>
    %261 = arith.addf %260, %259 : vector<2x192xf32>
    %262 = arith.divf %260, %261 : vector<2x192xf32>
    %263 = vector.extract_strided_slice %256 {offsets = [0, 192], sizes = [2, 64], strides = [1, 1]} : vector<2x256xf32> to vector<2x64xf32>
    %264 = math.tanh %263 : vector<2x64xf32>
    %265 = vector.extract_strided_slice %262 {offsets = [0, 0], sizes = [2, 64], strides = [1, 1]} : vector<2x192xf32> to vector<2x64xf32>
    %266 = vector.extract_strided_slice %262 {offsets = [0, 64], sizes = [2, 64], strides = [1, 1]} : vector<2x192xf32> to vector<2x64xf32>
    %267 = vector.extract_strided_slice %262 {offsets = [0, 128], sizes = [2, 64], strides = [1, 1]} : vector<2x192xf32> to vector<2x64xf32>
    %268 = arith.mulf %266, %253 : vector<2x64xf32>
    %269 = arith.mulf %265, %264 : vector<2x64xf32>
    %270 = arith.addf %268, %269 : vector<2x64xf32>
    %271 = math.tanh %270 : vector<2x64xf32>
    %272 = arith.mulf %267, %271 : vector<2x64xf32>
    %273 = arith.mulf %85, %272 : vector<2x64xf32>
    %274 = vector.extract_strided_slice %273 {offsets = [0, 0], sizes = [2, 32], strides = [1, 1]} : vector<2x64xf32> to vector<2x32xf32>
    %275 = vector.extract_strided_slice %273 {offsets = [0, 32], sizes = [2, 32], strides = [1, 1]} : vector<2x64xf32> to vector<2x32xf32>
    %276 = arith.subf %272, %250 : vector<2x64xf32>
    %277 = arith.mulf %85, %276 : vector<2x64xf32>
    %278 = arith.addf %250, %277 : vector<2x64xf32>
    %279 = arith.subf %270, %253 : vector<2x64xf32>
    %280 = arith.mulf %85, %279 : vector<2x64xf32>
    %281 = arith.addf %253, %280 : vector<2x64xf32>
    %282 = vector.extract_strided_slice %5 {offsets = [12, 0], sizes = [2, 256], strides = [1, 1]} : vector<16x256xf32> to vector<2x256xf32>
    %cst_31 = arith.constant dense<0.000000e+00> : vector<2x256xf32>
    %283 = tpu.matmul %278, %7, %cst_31 {dimension_numbers = #tpu.dot_dimension_numbers<[1], [0], [0], [1], [0, 0, 1, 1], [], []>} : vector<2x64xf32>, vector<64x256xf32>, vector<2x256xf32> -> vector<2x256xf32>
    %284 = arith.addf %282, %283 : vector<2x256xf32>
    %285 = vector.extract_strided_slice %284 {offsets = [0, 0], sizes = [2, 192], strides = [1, 1]} : vector<2x256xf32> to vector<2x192xf32>
    %286 = arith.negf %285 : vector<2x192xf32>
    %287 = math.exp %286 : vector<2x192xf32>
    %cst_32 = arith.constant 1.000000e+00 : f32
    %288 = vector.broadcast %cst_32 : f32 to vector<2x192xf32>
    %289 = arith.addf %288, %287 : vector<2x192xf32>
    %290 = arith.divf %288, %289 : vector<2x192xf32>
    %291 = vector.extract_strided_slice %284 {offsets = [0, 192], sizes = [2, 64], strides = [1, 1]} : vector<2x256xf32> to vector<2x64xf32>
    %292 = math.tanh %291 : vector<2x64xf32>
    %293 = vector.extract_strided_slice %290 {offsets = [0, 0], sizes = [2, 64], strides = [1, 1]} : vector<2x192xf32> to vector<2x64xf32>
    %294 = vector.extract_strided_slice %290 {offsets = [0, 64], sizes = [2, 64], strides = [1, 1]} : vector<2x192xf32> to vector<2x64xf32>
    %295 = vector.extract_strided_slice %290 {offsets = [0, 128], sizes = [2, 64], strides = [1, 1]} : vector<2x192xf32> to vector<2x64xf32>
    %296 = arith.mulf %294, %281 : vector<2x64xf32>
    %297 = arith.mulf %293, %292 : vector<2x64xf32>
    %298 = arith.addf %296, %297 : vector<2x64xf32>
    %299 = math.tanh %298 : vector<2x64xf32>
    %300 = arith.mulf %295, %299 : vector<2x64xf32>
    %301 = arith.mulf %98, %300 : vector<2x64xf32>
    %302 = vector.extract_strided_slice %301 {offsets = [0, 0], sizes = [2, 32], strides = [1, 1]} : vector<2x64xf32> to vector<2x32xf32>
    %303 = vector.extract_strided_slice %301 {offsets = [0, 32], sizes = [2, 32], strides = [1, 1]} : vector<2x64xf32> to vector<2x32xf32>
    %304 = arith.subf %300, %278 : vector<2x64xf32>
    %305 = arith.mulf %98, %304 : vector<2x64xf32>
    %306 = arith.addf %278, %305 : vector<2x64xf32>
    %307 = arith.subf %298, %281 : vector<2x64xf32>
    %308 = arith.mulf %98, %307 : vector<2x64xf32>
    %309 = arith.addf %281, %308 : vector<2x64xf32>
    %310 = vector.extract_strided_slice %5 {offsets = [14, 0], sizes = [2, 256], strides = [1, 1]} : vector<16x256xf32> to vector<2x256xf32>
    %cst_33 = arith.constant dense<0.000000e+00> : vector<2x256xf32>
    %311 = tpu.matmul %306, %7, %cst_33 {dimension_numbers = #tpu.dot_dimension_numbers<[1], [0], [0], [1], [0, 0, 1, 1], [], []>} : vector<2x64xf32>, vector<64x256xf32>, vector<2x256xf32> -> vector<2x256xf32>
    %312 = arith.addf %310, %311 : vector<2x256xf32>
    %313 = vector.extract_strided_slice %312 {offsets = [0, 0], sizes = [2, 192], strides = [1, 1]} : vector<2x256xf32> to vector<2x192xf32>
    %314 = arith.negf %313 : vector<2x192xf32>
    %315 = math.exp %314 : vector<2x192xf32>
    %cst_34 = arith.constant 1.000000e+00 : f32
    %316 = vector.broadcast %cst_34 : f32 to vector<2x192xf32>
    %317 = arith.addf %316, %315 : vector<2x192xf32>
    %318 = arith.divf %316, %317 : vector<2x192xf32>
    %319 = vector.extract_strided_slice %312 {offsets = [0, 192], sizes = [2, 64], strides = [1, 1]} : vector<2x256xf32> to vector<2x64xf32>
    %320 = math.tanh %319 : vector<2x64xf32>
    %321 = vector.extract_strided_slice %318 {offsets = [0, 0], sizes = [2, 64], strides = [1, 1]} : vector<2x192xf32> to vector<2x64xf32>
    %322 = vector.extract_strided_slice %318 {offsets = [0, 64], sizes = [2, 64], strides = [1, 1]} : vector<2x192xf32> to vector<2x64xf32>
    %323 = vector.extract_strided_slice %318 {offsets = [0, 128], sizes = [2, 64], strides = [1, 1]} : vector<2x192xf32> to vector<2x64xf32>
    %324 = arith.mulf %322, %309 : vector<2x64xf32>
    %325 = arith.mulf %321, %320 : vector<2x64xf32>
    %326 = arith.addf %324, %325 : vector<2x64xf32>
    %327 = math.tanh %326 : vector<2x64xf32>
    %328 = arith.mulf %323, %327 : vector<2x64xf32>
    %329 = arith.mulf %111, %328 : vector<2x64xf32>
    %330 = vector.extract_strided_slice %329 {offsets = [0, 0], sizes = [2, 32], strides = [1, 1]} : vector<2x64xf32> to vector<2x32xf32>
    %331 = vector.extract_strided_slice %329 {offsets = [0, 32], sizes = [2, 32], strides = [1, 1]} : vector<2x64xf32> to vector<2x32xf32>
    %332 = arith.subf %328, %306 : vector<2x64xf32>
    %333 = arith.mulf %111, %332 : vector<2x64xf32>
    %334 = arith.addf %306, %333 : vector<2x64xf32>
    %335 = arith.subf %326, %309 : vector<2x64xf32>
    %336 = arith.mulf %111, %335 : vector<2x64xf32>
    %337 = arith.addf %309, %336 : vector<2x64xf32>
    %338 = vector.extract_strided_slice %334 {offsets = [0, 0], sizes = [2, 32], strides = [1, 1]} : vector<2x64xf32> to vector<2x32xf32>
    %339 = vector.extract_strided_slice %334 {offsets = [0, 32], sizes = [2, 32], strides = [1, 1]} : vector<2x64xf32> to vector<2x32xf32>
    %340 = arith.addf %338, %339 : vector<2x32xf32>
    %cst_35 = arith.constant 5.000000e-01 : f32
    %341 = vector.broadcast %cst_35 : f32 to vector<2x32xf32>
    %342 = arith.mulf %340, %341 : vector<2x32xf32>
    %c0_36 = arith.constant 0 : index
    %c0_37 = arith.constant 0 : index
    %343 = vector.load %arg8[%c0_36, %c0_37] : memref<2x32xf32, #tpu.memory_space<vmem>>, vector<2x32xf32>
    tpu.vector_store %arg8[%c0_36, %c0_37], %342 {strides = array<i32>} : memref<2x32xf32, #tpu.memory_space<vmem>>, vector<2x32xf32>,
    %344 = vector.extract_strided_slice %337 {offsets = [0, 0], sizes = [2, 32], strides = [1, 1]} : vector<2x64xf32> to vector<2x32xf32>
    %345 = vector.extract_strided_slice %337 {offsets = [0, 32], sizes = [2, 32], strides = [1, 1]} : vector<2x64xf32> to vector<2x32xf32>
    %346 = arith.addf %344, %345 : vector<2x32xf32>
    %cst_38 = arith.constant 5.000000e-01 : f32
    %347 = vector.broadcast %cst_38 : f32 to vector<2x32xf32>
    %348 = arith.mulf %346, %347 : vector<2x32xf32>
    %c0_39 = arith.constant 0 : index
    %c0_40 = arith.constant 0 : index
    %349 = vector.load %arg9[%c0_39, %c0_40] : memref<2x32xf32, #tpu.memory_space<vmem>>, vector<2x32xf32>
    tpu.vector_store %arg9[%c0_39, %c0_40], %348 {strides = array<i32>} : memref<2x32xf32, #tpu.memory_space<vmem>>, vector<2x32xf32>,
    %350 = tpu.concatenate %134, %162, %190, %218, %246, %274, %302, %330 in 0 : vector<2x32xf32>, vector<2x32xf32>, vector<2x32xf32>, vector<2x32xf32>, vector<2x32xf32>, vector<2x32xf32>, vector<2x32xf32>, vector<2x32xf32> -> vector<16x32xf32>
    %351 = tpu.concatenate %331, %303, %275, %247, %219, %191, %163, %135 in 0 : vector<2x32xf32>, vector<2x32xf32>, vector<2x32xf32>, vector<2x32xf32>, vector<2x32xf32>, vector<2x32xf32>, vector<2x32xf32>, vector<2x32xf32> -> vector<16x32xf32>
    %352 = tpu.concatenate %350, %351 in 1 : vector<16x32xf32>, vector<16x32xf32> -> vector<16x64xf32>
    %c0_41 = arith.constant 0 : index
    %c0_42 = arith.constant 0 : index
    %353 = vector.load %arg5[%c0_41, %c0_42] : memref<64x32xf32, #tpu.memory_space<vmem>>, vector<64x32xf32>
    %cst_43 = arith.constant dense<0.000000e+00> : vector<16x32xf32>
    %354 = tpu.matmul %352, %353, %cst_43 {dimension_numbers = #tpu.dot_dimension_numbers<[1], [0], [0], [1], [0, 0, 1, 1], [], []>} : vector<16x64xf32>, vector<64x32xf32>, vector<16x32xf32> -> vector<16x32xf32>
    %c0_44 = arith.constant 0 : index
    %c0_45 = arith.constant 0 : index
    %355 = vector.load %arg6[%c0_44, %c0_45] : memref<1x32xf32, #tpu.memory_space<vmem>>, vector<1x32xf32>
    %356 = vector.broadcast %355 : vector<1x32xf32> to vector<16x32xf32>
    %357 = arith.addf %354, %356 : vector<16x32xf32>
    %c0_46 = arith.constant 0 : index
    %c0_47 = arith.constant 0 : index
    %358 = vector.load %arg7[%c0_46, %c0_47] : memref<16x32xf32, #tpu.memory_space<vmem>>, vector<16x32xf32>
    tpu.vector_store %arg7[%c0_46, %c0_47], %357 {strides = array<i32>} : memref<16x32xf32, #tpu.memory_space<vmem>>, vector<16x32xf32>,
    return
  }
}

</mosaic_0001>

<bundles_post_ra>
// kernel: encoder_forward.1
= control target key start
LH: loop header
LB: loop body
LE: loop exit
PB: predicated region body
PF: predicated region fallthrough
CT: control target
= control target key end

     0   :  { %15 = vsyncpa [#allocation3], 0  ;;  %s2210_s0 = inlined_call_operand.vmem [shape: f32[16,64], index: 0, kind: input, shape index: {}]   ;;  %s2211_s1 = inlined_call_operand.vmem [shape: s32[2,1], index: 1, kind: input, shape index: {}]   ;;  %s2212_s2 = inlined_call_operand.vmem [shape: f32[64,256], index: 2, kind: input, shape index: {}]   ;;  %s2213_s3 = inlined_call_operand.vmem [shape: f32[1,256], index: 3, kind: input, shape index: {}]   ;;  %s2214_s4 = inlined_call_operand.vmem [shape: f32[64,256], index: 4, kind: input, shape index: {}]   ;;  %s2215_s5 = inlined_call_operand.vmem [shape: f32[64,32], index: 5, kind: input, shape index: {}]   ;;  %s2216_s6 = inlined_call_operand.vmem [shape: f32[1,32], index: 6, kind: input, shape index: {}]   ;;  %s2217_s7 = inlined_call_operand.vmem [shape: f32[16,32], index: 7, kind: output, shape index: {0}]   ;;  %s2218_s8 = inlined_call_operand.hbm [shape: f32[2,32], index: 8, kind: output, shape index: {1}]   ;;  %s2219_s9 = inlined_call_operand.hbm [shape: f32[2,32], index: 9, kind: output, shape index: {2}]  }
   0x1   :  { %v1638_v0 = vld [vmem:[%s2214_s4 + $0x70] sm:$0xff]  ;;  %v1643_v1 = vld [vmem:[%s2214_s4 + $0x60] sm:$0xff]  ;;  %v48_v10 = vld [vmem:[%s2212_s2 + $0x78] sm:$0xff] }
   0x2   :  { %v47_v2 = vld [vmem:[%s2212_s2 + $0x70] sm:$0xff]  ;;  %209 = vmatpush.msra.mxu3 %v1638_v0  ;;  %v45_v3 = vld [vmem:[%s2212_s2 + $0x60] sm:$0xff]  ;;  %450 = vmatpush.msra.mxu2 %v1638_v0  ;;  %v46_v11 = vld [vmem:[%s2212_s2 + $0x68] sm:$0xff] }
   0x3   :  { %70 = vmatpush.msra.mxu0 %v47_v2  ;;  %v1655_v4 = vld [vmem:[%s2214_s4 + $0x50] sm:$0xff]  ;;  %v1665_v6 = vld [vmem:[%s2214_s4 + $0x40] sm:$0xff]  ;;  %93 = vmatpush.msra.mxu1 %v48_v10  ;;  %v44_v14 = vld [vmem:[%s2212_s2 + $0x58] sm:$0xff] }
   0x4   :  { %v43_v5 = vld [vmem:[%s2212_s2 + $0x50] sm:$0xff]  ;;  %210 = vmatpush.msra.mxu3 %v1643_v1  ;;  %v41_v7 = vld [vmem:[%s2212_s2 + $0x40] sm:$0xff]  ;;  %451 = vmatpush.msra.mxu2 %v1643_v1  ;;  %v42_v17 = vld [vmem:[%s2212_s2 + $0x48] sm:$0xff] }
   0x5   :  { %71 = vmatpush.msra.mxu0 %v45_v3  ;;  %v1675_v8 = vld [vmem:[%s2214_s4 + $0x30] sm:$0xff]  ;;  %v1691_v12 = vld [vmem:[%s2214_s4 + $0x20] sm:$0xff]  ;;  %94 = vmatpush.msra.mxu1 %v46_v11 }
   0x6   :  { %211 = vmatpush.msra.mxu3 %v1655_v4  ;;  %v39_v9 = vld [vmem:[%s2212_s2 + $0x30] sm:$0xff]  ;;  %452 = vmatpush.msra.mxu2 %v1655_v4  ;;  %v37_v13 = vld [vmem:[%s2212_s2 + $0x20] sm:$0xff] }
   0x7   :  { %72 = vmatpush.msra.mxu0 %v43_v5  ;;  %v1704_v15 = vld [vmem:[%s2214_s4 + $0x10] sm:$0xff] }
   0x8   :  { %212 = vmatpush.msra.mxu3 %v1665_v6  ;;  %453 = vmatpush.msra.mxu2 %v1665_v6  ;;  %v35_v16 = vld [vmem:[%s2212_s2 + $0x10] sm:$0xff] }
   0x9   :  { %73 = vmatpush.msra.mxu0 %v41_v7 }
   0xa   :  { %213 = vmatpush.msra.mxu3 %v1675_v8  ;;  %454 = vmatpush.msra.mxu2 %v1675_v8 }
   0xb   :  { %74 = vmatpush.msra.mxu0 %v39_v9 }
   0xc   :  { %214 = vmatpush.msra.mxu3 %v1691_v12 }
   0xd   :  { %75 = vmatpush.msra.mxu0 %v37_v13 }
   0xe   :  { %16 = vsyncpa [#allocation5], 0  ;;  %v1717_v18 = vld [vmem:[%s2214_s4] sm:$0xff]  ;;  %95 = vmatpush.msra.mxu1 %v44_v14  ;;  %455 = vmatpush.msra.mxu2 %v1691_v12  ;;  %vm55_vm0 = vcmask 523264   ;;  %v1730_v21 = vld [vmem:[%s2214_s4 + $0x78] sm:$0xff]  ;;  %v1579_v23 = vmov 0.0  }
   0xf   :  { %v33_v19 = vld [vmem:[%s2212_s2] sm:$0xff]  ;;  %215 = vmatpush.msra.mxu3 %v1704_v15  ;;  %76 = vmatpush.msra.mxu0 %v35_v16  ;;  %v40_v22 = vld [vmem:[%s2212_s2 + $0x38] sm:$0xff]  ;;  %v1741_v24 = vld [vmem:[%s2214_s4 + $0x68] sm:$0xff]  ;;  %s1580_s12 = smov 64   ;;  %v1581_v61 = vmov 0   ;;  %vm141_vm11 = vcmask 261120  }
  0x10   :  { %v31_v20 = vld [vmem:[%s2210_s0] sm:$0xff]  ;;  %96 = vmatpush.msra.mxu1 %v42_v17  ;;  %456 = vmatpush.msra.mxu2 %v1704_v15  ;;  %v38_v25 = vld [vmem:[%s2212_s2 + $0x28] sm:$0xff]  ;;  %v1751_v26 = vld [vmem:[%s2214_s4 + $0x58] sm:$0xff]  ;;  %s1583_s29 = smov [#allocation2]   ;;  %s1331_s11 = sshll.u32 %s2218_s8, 4  ;;  %s1332_s11 = int_to_ptr.hbm [resolvable:$true] %s1331_s11 }
  0x11   :  { %216 = vmatpush.msra.mxu3 %v1717_v18  ;;  %77 = vmatpush.msra.mxu0 %v33_v19  ;;  %v36_v27 = vld [vmem:[%s2212_s2 + $0x18] sm:$0xff]  ;;  %v1762_v28 = vld [vmem:[%s2214_s4 + $0x48] sm:$0xff]  ;;  %v1853_v34 = vld [vmem:[%s2213_s3] sm:$0x3]  ;;  %s1329_s30 = sshll.u32 %s1583_s29, 4  ;;  %s1342_s15 = sshll.u32 %s2219_s9, 4  ;;  %s1330_s30 = int_to_ptr.vmem [resolvable:$true] %s1329_s30  ;;  %s1343_s15 = int_to_ptr.hbm [resolvable:$true] %s1342_s15 }
  0x12   :  { %217 = vmatmul.f32.vlgmr.msra.gmra.mxu3 %v1579_v23  ;;  %1358 = vmatmul.msk.f32.vlgmr.msra.gmra.mxu0 %vm55_vm0, %v31_v20  ;;  %v34_v29 = vld [vmem:[%s2212_s2 + $0x8] sm:$0xff]  ;;  %v1773_v30 = vld [vmem:[%s2214_s4 + $0x38] sm:$0xff]  ;;  %v52_v36 = vperm.slane %v1853_v34, 1  ;;  %v51_v42 = vperm.slane %v1853_v34, 0  ;;  %v1873_v3 = vld [vmem:[%s2211_s1] sm:$0x3] }
  0x13   :  { %229 = vmatpush.msrb.mxu3 %v1730_v21  ;;  %97 = vmatpush.msra.mxu1 %v40_v22  ;;  %v1781_v31 = vld [vmem:[%s2214_s4 + $0x28] sm:$0xff]  ;;  %v1790_v32 = vld [vmem:[%s2214_s4 + $0x18] sm:$0xff]  ;;  %vm125_vm5 = vcmp.gt.s32.totalorder %v1873_v3, 0  ;;  %vm128_vm6 = vcmp.gt.s32.totalorder %v1873_v3, 7  ;;  %vm143_vm12 = vcmp.gt.s32.totalorder %v1873_v3, 1  ;;  %vm146_vm13 = vcmp.gt.s32.totalorder %v1873_v3, 6 }
  0x14   :  { %318 = vmatpush.msrb.mxu0 %v1638_v0  ;;  %457 = vmatpush.msra.mxu2 %v1717_v18  ;;  %v1799_v33 = vld [vmem:[%s2214_s4 + $0x8] sm:$0xff]  ;;  %v1362_v7 = vsel %vm125_vm5, 1.0, %v1579_v23  ;;  %v1363_v9 = vsel %vm128_vm6, 1.0, %v1579_v23 }
  0x15   :  { %230 = vmatpush.msrb.mxu3 %v1741_v24  ;;  %98 = vmatpush.msra.mxu1 %v38_v25  ;;  %v1409_v10 = vpack.i.bf16 %v1363_v9, %v1362_v7  ;;  %v32_v13 = vld [vmem:[%s2210_s0 + $0x8] sm:$0xff]  ;;  %v1365_v7 = vsel %vm146_vm13, 1.0, %v1579_v23 }
  0x16   :  { %319 = vmatpush.msrb.mxu0 %v1643_v1  ;;  %714 = vmatpush.msrb.mxu2 %v1638_v0 }
  0x17   :  { %231 = vmatpush.msrb.mxu3 %v1751_v26  ;;  %99 = vmatpush.msra.mxu1 %v36_v27 }
  0x18   :  { %320 = vmatpush.msrb.mxu0 %v1655_v4  ;;  %715 = vmatpush.msrb.mxu2 %v1643_v1 }
  0x19   :  { %232 = vmatpush.msrb.mxu3 %v1762_v28  ;;  %100 = vmatpush.msra.mxu1 %v34_v29 }
  0x1a   :  { %1360 = vmatmul.msk.f32.vlgmr.msra.gmra.mxu1 %vm55_vm0, %v31_v20  ;;  %321 = vmatpush.msrb.mxu0 %v1665_v6 }
  0x1b   :  { %233 = vmatpush.msrb.mxu3 %v1773_v30  ;;  %338 = vmatpush.msrb.mxu1 %v1730_v21 }
  0x1c   :  { %322 = vmatpush.msrb.mxu0 %v1675_v8  ;;  %716 = vmatpush.msrb.mxu2 %v1655_v4 }
  0x1d   :  { %234 = vmatpush.msrb.mxu3 %v1781_v31  ;;  %339 = vmatpush.msrb.mxu1 %v1741_v24 }
  0x1e   :  { %323 = vmatpush.msrb.mxu0 %v1691_v12  ;;  %717 = vmatpush.msrb.mxu2 %v1665_v6 }
  0x1f   :  { %235 = vmatpush.msrb.mxu3 %v1790_v32  ;;  %340 = vmatpush.msrb.mxu1 %v1751_v26 }
  0x20   :  { %324 = vmatpush.msrb.mxu0 %v1704_v15  ;;  %718 = vmatpush.msrb.mxu2 %v1675_v8 }
  0x21   :  { %236 = vmatpush.msrb.mxu3 %v1799_v33  ;;  %341 = vmatpush.msrb.mxu1 %v1762_v28 }
  0x22   :  { %237 = vmatmul.f32.vlgmr.msrb.gmra.mxu3 %v1579_v23  ;;  %325 = vmatpush.msrb.mxu0 %v1717_v18 }
  0x23   :  { %342 = vmatpush.msrb.mxu1 %v1773_v30  ;;  %470 = vmatpush.msra.mxu3 %v1730_v21 }
  0x24   :  { %582 = vmatpush.msra.mxu0 %v1638_v0  ;;  %719 = vmatpush.msrb.mxu2 %v1691_v12 }
  0x25   :  { %343 = vmatpush.msrb.mxu1 %v1781_v31  ;;  %471 = vmatpush.msra.mxu3 %v1741_v24 }
  0x26   :  { %583 = vmatpush.msra.mxu0 %v1643_v1  ;;  %720 = vmatpush.msrb.mxu2 %v1704_v15 }
  0x27   :  { %344 = vmatpush.msrb.mxu1 %v1790_v32  ;;  %472 = vmatpush.msra.mxu3 %v1751_v26 }
  0x28   :  { %584 = vmatpush.msra.mxu0 %v1655_v4  ;;  %721 = vmatpush.msrb.mxu2 %v1717_v18 }
  0x29   :  { %345 = vmatpush.msrb.mxu1 %v1799_v33  ;;  %473 = vmatpush.msra.mxu3 %v1762_v28 }
  0x2a   :  { %585 = vmatpush.msra.mxu0 %v1665_v6  ;;  %1408 = vset.pattern.permute.xlu1 %v1581_v61 }
  0x2b   :  { %602 = vmatpush.msra.mxu1 %v1730_v21  ;;  %474 = vmatpush.msra.mxu3 %v1773_v30 }
  0x2c   :  { %586 = vmatpush.msra.mxu0 %v1675_v8  ;;  %1414 = vset.pattern.permute.xlu0 %v1581_v61 }
  0x2d   :  { %603 = vmatpush.msra.mxu1 %v1741_v24  ;;  %475 = vmatpush.msra.mxu3 %v1781_v31 }
  0x2e   :  { %587 = vmatpush.msra.mxu0 %v1691_v12  ;;  %1361 = vmatmul.msk.f32.gmra.mxu1 %vm55_vm0, %v32_v13 }
  0x2f   :  { %604 = vmatpush.msra.mxu1 %v1751_v26  ;;  %476 = vmatpush.msra.mxu3 %v1790_v32 }
  0x30   :  { %588 = vmatpush.msra.mxu0 %v1704_v15 }
  0x31   :  { %605 = vmatpush.msra.mxu1 %v1762_v28  ;;  %477 = vmatpush.msra.mxu3 %v1799_v33 }
  0x32   :  { %589 = vmatpush.msra.mxu0 %v1717_v18 }
  0x33   :  { %606 = vmatpush.msra.mxu1 %v1773_v30  ;;  %734 = vmatpush.msrb.mxu3 %v1730_v21 }
  0x34   :  { %1359 = vmatmul.msk.f32.gmra.mxu0 %vm55_vm0, %v32_v13 }
  0x35   :  { %607 = vmatpush.msra.mxu1 %v1781_v31  ;;  %735 = vmatpush.msrb.mxu3 %v1741_v24 }
  0x37   :  { %608 = vmatpush.msra.mxu1 %v1790_v32  ;;  %736 = vmatpush.msrb.mxu3 %v1751_v26 }
  0x39   :  { %609 = vmatpush.msra.mxu1 %v1799_v33  ;;  %737 = vmatpush.msrb.mxu3 %v1762_v28 }
  0x3b   :  { %738 = vmatpush.msrb.mxu3 %v1773_v30 }
  0x3d   :  { %739 = vmatpush.msrb.mxu3 %v1781_v31 }
  0x3f   :  { %740 = vmatpush.msrb.mxu3 %v1790_v32 }
  0x41   :  { %741 = vmatpush.msrb.mxu3 %v1799_v33 }
  0x8f   :  { %v79_v43 = vpop.f32.mrf.mxu0 }
  0x90   :  { %v1865_v44 = vadd.f32 %v79_v43, %v51_v42 }
  0x95   :  { %v218_v35 = vpop.f32.mrf.mxu3 }
  0x96   :  { %v241_v45 = vadd.f32 %v218_v35, %v1865_v44 }
  0x97   :  { %v102_v37 = vpop.f32.mrf.mxu1 }
  0x98   :  { %v1858_v38 = vadd.f32 %v102_v37, %v52_v36  ;;  %v1370_v46 = vmul.f32 -1.442695, %v241_v45 }
  0xa5   :  { %v238_v39 = vpop.f32.mrf.mxu3 }
  0xa6   :  { %v242_v40 = vadd.f32 %v238_v39, %v1858_v38 }
  0xa8   :  { %1431 = vtanh.f32 %v242_v40  ;;  %v1371_v11 = vmul.f32 -1.442695, %v242_v40 }
  0xa9   :  { %1433 = vpow2.f32 %v1370_v46 }
  0xae   :  { %v1432_v41 = vpop.eup %1431 }
  0xaf   :  { %284 = vrot.lane.b32.xlu0 %v1432_v41, %s1580_s12  ;;  %v1434_v47 = vpop.eup %1433 }
  0xb0   :  { %v249_v48 = vadd.f32 1.0, %v1434_v47 }
  0xb2   :  { %1435 = vrcp.f32 %v249_v48  ;;  %vm256_vm1 = vweird.f32 %v249_v48  ;;  %v262_v54 = vand.u32 2147483648, %v249_v48  ;;  %v260_v55 = vand.u32 2147483647, %v249_v48 }
  0xb4   :  { %v263_v57 = vor.u32 1.1754944e-38, %v262_v54  ;;  %vm261_vm4 = vcmp.eq.f32.partialorder %v260_v55, 8.507059e+37 }
  0xb8   :  { %v1436_v49 = vpop.eup %1435 }
  0xb9   :  { %v252_v50 = vmul.f32 %v1436_v49, %v249_v48  ;;  %vm257_vm2 = vweird.f32 %v1436_v49 }
  0xba   :  { %vm258_vm3 = vmor %vm256_vm1, %vm257_vm2 }
  0xbb   :  { %v253_v51 = vsub.f32 1.0, %v252_v50 }
  0xbd   :  { %v254_v52 = vmul.f32 %v1436_v49, %v253_v51 }
  0xbf   :  { %v255_v53 = vadd.f32 %v1436_v49, %v254_v52 }
  0xc1   :  { %v259_v56 = vsel %vm258_vm3, %v1436_v49, %v255_v53  ;;  %v1915_v53 = vpop.f32.mrf.mxu1 }
  0xc2   :  { %v264_v59 = vsel %vm261_vm4, %v263_v57, %v259_v56 }
  0xc3   :  { %v282_v62 = vmul.f32 0.0, %v264_v59 }
 0x121   :  { %v285_v58 = vpop.permute.xlu0 %284 }
 0x122   :  { %v287_v60 = vmul.f32 %v285_v58, %v264_v59  ;;  %v1919_v58 = vpop.f32.mrf.mxu0 }
 0x124   :  { %289 = vrot.lane.b32.xlu0 %v287_v60, %s1580_s12 }
 0x196   :  { %v290_v63 = vpop.permute.xlu0 %289 }
 0x197   :  { %v292_v2 = vadd.f32 %v290_v63, %v282_v62 }
 0x199   :  { %1437 = vtanh.f32 %v292_v2  ;;  %302 = vrot.lane.b32.xlu2 %v292_v2, %s1580_s12 }
 0x19a   :  { %1439 = vpow2.f32 %v1371_v11 }
 0x19f   :  { %v1438_v5 = vpop.eup %1437 }
 0x1a0   :  { %295 = vrot.lane.b32.xlu1 %v1438_v5, %s1580_s12  ;;  %v1440_v14 = vpop.eup %1439  ;;  %v1364_v5 = vsel %vm143_vm12, 1.0, %v1579_v23 }
 0x1a1   :  { %v250_v16 = vadd.f32 1.0, %v1440_v14  ;;  %v1415_v9 = vpack.i.bf16 %v1365_v7, %v1364_v5 }
 0x1a3   :  { %1441 = vrcp.f32 %v250_v16  ;;  %v277_v29 = vand.u32 2147483648, %v250_v16  ;;  %vm271_vm8 = vweird.f32 %v250_v16  ;;  %v275_v35 = vand.u32 2147483647, %v250_v16 }
 0x1a5   :  { %v278_v39 = vor.u32 1.1754944e-38, %v277_v29  ;;  %vm276_vm10 = vcmp.eq.f32.partialorder %v275_v35, 8.507059e+37 }
 0x1a8   :  { %1410 = vperm.xlu1 %1408, %v1409_v10  }
 0x1a9   :  { %v1442_v17 = vpop.eup %1441 }
 0x1aa   :  { %v267_v19 = vmul.f32 %v1442_v17, %v250_v16  ;;  %vm272_vm7 = vweird.f32 %v1442_v17 }
 0x1ab   :  { %vm273_vm9 = vmor %vm271_vm8, %vm272_vm7  ;;  %vm160_vm7 = vcmp.gt.s32.totalorder %v1873_v3, 2  ;;  %vm163_vm8 = vcmp.gt.s32.totalorder %v1873_v3, 5 }
 0x1ac   :  { %v268_v20 = vsub.f32 1.0, %v267_v19 }
 0x1ae   :  { %v269_v22 = vmul.f32 %v1442_v17, %v268_v20 }
 0x1b0   :  { %v270_v27 = vadd.f32 %v1442_v17, %v269_v22 }
 0x1b2   :  { %v274_v37 = vsel %vm273_vm9, %v1442_v17, %v270_v27 }
 0x1b3   :  { %v279_v41 = vsel %vm276_vm10, %v278_v39, %v274_v37 }
 0x1f3   :  { %v303_v47 = vpop.permute.xlu2 %302 }
 0x212   :  { %v296_v25 = vpop.permute.xlu1 %295 }
 0x213   :  { %v298_v46 = vmul.f32 %v296_v25, %v279_v41 }
 0x21a   :  { %v1411_v40 = vpop.permute.xlu1 %1410 }
 0x21b   :  { %v1413_v43 = vunpack.i.h.bf16 %v1411_v40  ;;  %v1412_v45 = vunpack.i.l.bf16 %v1411_v40 }
 0x21d   :  { %v142_v48 = vsel %vm141_vm11, %v1412_v45, %v1413_v43  ;;  %v1887_v49 = vsel %vm141_vm11, %v1413_v43, %v1412_v45 }
 0x21e   :  { %v1889_v50 = vmul.f32 %v298_v46, %v142_v48  ;;  %v1891_v51 = vmul.f32 %v303_v47, %v142_v48 }
 0x220   :  { %1372 = vmatmul.msk.f32.vlgmr.msrb.gmra.mxu0 %vm55_vm0, %v1889_v50  ;;  %1373 = vmatmul.msk.f32.vlgmr.msrb.gmra.mxu1 %vm55_vm0, %v1889_v50  ;;  %v398_v52 = vrot.slane %v1891_v51, 6 }
 0x221   :  { %830 = vmatpush.msrb.mxu0 %v1638_v0  ;;  %850 = vmatpush.msrb.mxu1 %v1730_v21 }
 0x222   :  { %399 = vrot.lane.b32.xlu0 %v398_v52, %s1580_s12 }
 0x223   :  { %831 = vmatpush.msrb.mxu0 %v1643_v1  ;;  %851 = vmatpush.msrb.mxu1 %v1741_v24 }
 0x225   :  { %832 = vmatpush.msrb.mxu0 %v1655_v4  ;;  %852 = vmatpush.msrb.mxu1 %v1751_v26 }
 0x227   :  { %833 = vmatpush.msrb.mxu0 %v1665_v6  ;;  %853 = vmatpush.msrb.mxu1 %v1762_v28 }
 0x229   :  { %834 = vmatpush.msrb.mxu0 %v1675_v8  ;;  %854 = vmatpush.msrb.mxu1 %v1773_v30 }
 0x22a   :  { %1416 = vperm.xlu0 %1414, %v1415_v9  }
 0x22b   :  { %835 = vmatpush.msrb.mxu0 %v1691_v12  ;;  %855 = vmatpush.msrb.mxu1 %v1781_v31 }
 0x22d   :  { %836 = vmatpush.msrb.mxu0 %v1704_v15  ;;  %856 = vmatpush.msrb.mxu1 %v1790_v32 }
 0x22f   :  { %837 = vmatpush.msrb.mxu0 %v1717_v18  ;;  %857 = vmatpush.msrb.mxu1 %v1799_v33 }
 0x294   :  { %v400_v35 = vpop.permute.xlu0 %399 }
 0x29c   :  { %v1417_v52 = vpop.permute.xlu0 %1416 }
 0x29d   :  { %v347_v54 = vpop.f32.mrf.mxu1  ;;  %v327_v59 = vpop.f32.mrf.mxu0 }
 0x29e   :  { %v353_v55 = vrot.slane %v347_v54, 6  ;;  %v352_v60 = vrot.slane %v327_v59, 6  ;;  %v1419_v54 = vunpack.i.h.bf16 %v1417_v52 }
 0x2a0   :  { %v357_v56 = vadd.f32 %v353_v55, %v1858_v38  ;;  %v356_v61 = vadd.f32 %v352_v60, %v1865_v44  ;;  %v1418_v55 = vunpack.i.l.bf16 %v1417_v52 }
 0x2a2   :  { %1443 = vtanh.f32 %v357_v56  ;;  %v1374_v62 = vmul.f32 -1.442695, %v356_v61  ;;  %v1375_v46 = vmul.f32 -1.442695, %v357_v56 }
 0x2a4   :  { %1445 = vpow2.f32 %v1374_v62 }
 0x2a8   :  { %v1444_v57 = vpop.eup %1443 }
 0x2a9   :  { %404 = vrot.lane.b32.xlu2 %v1444_v57, %s1580_s12  ;;  %v1930_v57 = vsel %vm141_vm11, %v1419_v54, %v1418_v55 }
 0x2aa   :  { %v1446_v63 = vpop.eup %1445 }
 0x2ab   :  { %v364_v2 = vadd.f32 1.0, %v1446_v63 }
 0x2ad   :  { %1447 = vrcp.f32 %v364_v2  ;;  %v377_v17 = vand.u32 2147483648, %v364_v2  ;;  %vm371_vm15 = vweird.f32 %v364_v2  ;;  %v375_v19 = vand.u32 2147483647, %v364_v2 }
 0x2af   :  { %v378_v22 = vor.u32 1.1754944e-38, %v377_v17  ;;  %vm376_vm2 = vcmp.eq.f32.partialorder %v375_v19, 8.507059e+37 }
 0x2b3   :  { %v1448_v10 = vpop.eup %1447 }
 0x2b4   :  { %v367_v11 = vmul.f32 %v1448_v10, %v364_v2  ;;  %vm372_vm14 = vweird.f32 %v1448_v10 }
 0x2b5   :  { %vm373_vm1 = vmor %vm371_vm15, %vm372_vm14  ;;  %vm177_vm14 = vcmp.gt.s32.totalorder %v1873_v3, 3  ;;  %vm180_vm15 = vcmp.gt.s32.totalorder %v1873_v3, 4 }
 0x2b6   :  { %v368_v13 = vsub.f32 1.0, %v367_v11  ;;  %v423_v11 = vrot.slane %v1889_v50, 6 }
 0x2b8   :  { %v369_v14 = vmul.f32 %v1448_v10, %v368_v13 }
 0x2ba   :  { %v370_v16 = vadd.f32 %v1448_v10, %v369_v14  ;;  %v159_v14 = vsel %vm141_vm11, %v1418_v55, %v1419_v54 }
 0x2bc   :  { %v374_v20 = vsel %vm373_vm1, %v1448_v10, %v370_v16 }
 0x2bd   :  { %v379_v27 = vsel %vm376_vm2, %v378_v22, %v374_v20 }
 0x2be   :  { %v402_v37 = vmul.f32 %v400_v35, %v379_v27 }
 0x303   :  { %v405_v25 = vpop.permute.xlu2 %404 }
 0x304   :  { %v407_v29 = vmul.f32 %v405_v25, %v379_v27 }
 0x306   :  { %409 = vrot.lane.b32.xlu1 %v407_v29, %s1580_s12 }
 0x378   :  { %v410_v39 = vpop.permute.xlu1 %409 }
 0x379   :  { %v412_v40 = vadd.f32 %v410_v39, %v402_v37  ;;  %v1366_v39 = vsel %vm160_vm7, 1.0, %v1579_v23 }
 0x37b   :  { %1449 = vtanh.f32 %v412_v40  ;;  %v431_v41 = vsub.f32 %v412_v40, %v400_v35 }
 0x37c   :  { %1451 = vpow2.f32 %v1375_v46 }
 0x37d   :  { %v433_v43 = vrot.slane %v431_v41, 2 }
 0x37f   :  { %434 = vrot.lane.b32.xlu1 %v433_v43, %s1580_s12 }
 0x381   :  { %v1450_v45 = vpop.eup %1449 }
 0x382   :  { %415 = vrot.lane.b32.xlu2 %v1450_v45, %s1580_s12  ;;  %v1452_v47 = vpop.eup %1451 }
 0x383   :  { %v365_v48 = vadd.f32 1.0, %v1452_v47 }
 0x385   :  { %1453 = vrcp.f32 %v365_v48  ;;  %v392_v2 = vand.u32 2147483648, %v365_v48  ;;  %vm386_vm4 = vweird.f32 %v365_v48  ;;  %v390_v5 = vand.u32 2147483647, %v365_v48 }
 0x387   :  { %v393_v7 = vor.u32 1.1754944e-38, %v392_v2  ;;  %vm391_vm6 = vcmp.eq.f32.partialorder %v390_v5, 8.507059e+37 }
 0x38b   :  { %v1454_v59 = vpop.eup %1453 }
 0x38c   :  { %v382_v60 = vmul.f32 %v1454_v59, %v365_v48  ;;  %vm387_vm3 = vweird.f32 %v1454_v59 }
 0x38d   :  { %vm388_vm5 = vmor %vm386_vm4, %vm387_vm3 }
 0x38e   :  { %v383_v61 = vsub.f32 1.0, %v382_v60 }
 0x390   :  { %v384_v62 = vmul.f32 %v1454_v59, %v383_v61 }
 0x392   :  { %v385_v63 = vadd.f32 %v1454_v59, %v384_v62 }
 0x394   :  { %v389_v56 = vsel %vm388_vm5, %v1454_v59, %v385_v63  ;;  %vm1248_vm5 = vcmask 1041408  }
 0x395   :  { %v394_v9 = vsel %vm391_vm6, %v393_v7, %v389_v56  ;;  %vm1250_vm6 = vcmask 1043456  }
 0x3dc   :  { %v416_v10 = vpop.permute.xlu2 %415 }
 0x3dd   :  { %v418_v13 = vmul.f32 %v416_v10, %v394_v9 }
 0x3df   :  { %v420_v16 = vrot.slane %v418_v13, 2  ;;  %v425_v17 = vsub.f32 %v418_v13, %v423_v11 }
 0x3e1   :  { %v427_v19 = vrot.slane %v425_v17, 2  ;;  %v1934_v20 = vmul.f32 %v420_v16, %v159_v14 }
 0x3e3   :  { %v429_v22 = vmul.f32 %v427_v19, %v159_v14 }
 0x3e5   :  { %v1937_v25 = vadd.f32 %v429_v22, %v1889_v50 }
 0x3e7   :  { %1376 = vmatmul.msk.f32.vlgmr.msra.gmra.mxu2 %vm55_vm0, %v1937_v25  ;;  %1377 = vmatmul.msk.f32.vlgmr.msra.gmra.mxu3 %vm55_vm0, %v1937_v25 }
 0x3e8   :  { %962 = vmatpush.msra.mxu2 %v1638_v0  ;;  %982 = vmatpush.msra.mxu3 %v1730_v21 }
 0x3ea   :  { %963 = vmatpush.msra.mxu2 %v1643_v1  ;;  %983 = vmatpush.msra.mxu3 %v1741_v24 }
 0x3ec   :  { %964 = vmatpush.msra.mxu2 %v1655_v4  ;;  %984 = vmatpush.msra.mxu3 %v1751_v26 }
 0x3ee   :  { %965 = vmatpush.msra.mxu2 %v1665_v6  ;;  %985 = vmatpush.msra.mxu3 %v1762_v28 }
 0x3f0   :  { %966 = vmatpush.msra.mxu2 %v1675_v8  ;;  %986 = vmatpush.msra.mxu3 %v1773_v30 }
 0x3f1   :  { %v435_v27 = vpop.permute.xlu1 %434 }
 0x3f2   :  { %v437_v29 = vmul.f32 %v435_v27, %v159_v14  ;;  %967 = vmatpush.msra.mxu2 %v1691_v12  ;;  %987 = vmatpush.msra.mxu3 %v1781_v31 }
 0x3f4   :  { %v1956_v35 = vadd.f32 %v437_v29, %v1891_v51  ;;  %968 = vmatpush.msra.mxu2 %v1704_v15  ;;  %988 = vmatpush.msra.mxu3 %v1790_v32  ;;  %v1367_v51 = vsel %vm163_vm8, 1.0, %v1579_v23 }
 0x3f5   :  { %v1420_v40 = vpack.i.bf16 %v1367_v51, %v1366_v39 }
 0x3f6   :  { %v530_v37 = vrot.slane %v1956_v35, 4  ;;  %969 = vmatpush.msra.mxu2 %v1717_v18  ;;  %989 = vmatpush.msra.mxu3 %v1799_v33 }
 0x3f8   :  { %531 = vrot.lane.b32.xlu1 %v530_v37, %s1580_s12 }
 0x400   :  { %1421 = vperm.xlu1 %1408, %v1420_v40  }
 0x46a   :  { %v532_v41 = vpop.permute.xlu1 %531  ;;  %v479_v43 = vpop.f32.mrf.mxu3 }
 0x46b   :  { %v485_v45 = vrot.slane %v479_v43, 4  ;;  %v459_v59 = vpop.f32.mrf.mxu2 }
 0x46c   :  { %v484_v60 = vrot.slane %v459_v59, 4 }
 0x46d   :  { %v489_v46 = vadd.f32 %v485_v45, %v1858_v38 }
 0x46e   :  { %v488_v61 = vadd.f32 %v484_v60, %v1865_v44 }
 0x46f   :  { %1455 = vtanh.f32 %v489_v46  ;;  %v1379_v43 = vmul.f32 -1.442695, %v489_v46  ;;  %v1368_v46 = vsel %vm177_vm14, 1.0, %v1579_v23 }
 0x470   :  { %v1378_v62 = vmul.f32 -1.442695, %v488_v61 }
 0x472   :  { %v1422_v47 = vpop.permute.xlu1 %1421  ;;  %1457 = vpow2.f32 %v1378_v62 }
 0x473   :  { %v1424_v48 = vunpack.i.h.bf16 %v1422_v47  ;;  %v1423_v52 = vunpack.i.l.bf16 %v1422_v47 }
 0x475   :  { %v1970_v54 = vsel %vm141_vm11, %v1424_v48, %v1423_v52  ;;  %v1456_v55 = vpop.eup %1455 }
 0x476   :  { %536 = vrot.lane.b32.xlu2 %v1456_v55, %s1580_s12  ;;  %v176_v55 = vsel %vm141_vm11, %v1423_v52, %v1424_v48 }
 0x478   :  { %v1458_v63 = vpop.eup %1457 }
 0x479   :  { %v496_v2 = vadd.f32 1.0, %v1458_v63  ;;  %v1369_v63 = vsel %vm180_vm15, 1.0, %v1579_v23 }
 0x47a   :  { %v1425_v48 = vpack.i.bf16 %v1369_v63, %v1368_v46 }
 0x47b   :  { %1459 = vrcp.f32 %v496_v2  ;;  %v509_v11 = vand.u32 2147483648, %v496_v2  ;;  %vm503_vm10 = vweird.f32 %v496_v2  ;;  %v507_v13 = vand.u32 2147483647, %v496_v2 }
 0x47d   :  { %v510_v16 = vor.u32 1.1754944e-38, %v509_v11  ;;  %vm508_vm13 = vcmp.eq.f32.partialorder %v507_v13, 8.507059e+37  ;;  %v555_v13 = vrot.slane %v1937_v25, 4 }
 0x481   :  { %v1460_v5 = vpop.eup %1459 }
 0x482   :  { %v499_v56 = vmul.f32 %v1460_v5, %v496_v2  ;;  %vm504_vm9 = vweird.f32 %v1460_v5 }
 0x483   :  { %vm505_vm12 = vmor %vm503_vm10, %vm504_vm9 }
 0x484   :  { %v500_v7 = vsub.f32 1.0, %v499_v56 }
 0x486   :  { %v501_v9 = vmul.f32 %v1460_v5, %v500_v7 }
 0x488   :  { %v502_v10 = vadd.f32 %v1460_v5, %v501_v9 }
 0x48a   :  { %v506_v14 = vsel %vm505_vm12, %v1460_v5, %v502_v10 }
 0x48b   :  { %v511_v19 = vsel %vm508_vm13, %v510_v16, %v506_v14 }
 0x48c   :  { %v534_v27 = vmul.f32 %v532_v41, %v511_v19 }
 0x4d0   :  { %v537_v17 = vpop.permute.xlu2 %536 }
 0x4d1   :  { %v539_v22 = vmul.f32 %v537_v17, %v511_v19  ;;  %v1231_v17 = vrot.slane %v1934_v20, 6 }
 0x4d3   :  { %541 = vrot.lane.b32.xlu2 %v539_v22, %s1580_s12 }
 0x52d   :  { %v542_v29 = vpop.permute.xlu2 %541 }
 0x52e   :  { %v544_v37 = vadd.f32 %v542_v29, %v534_v27 }
 0x530   :  { %1461 = vtanh.f32 %v544_v37  ;;  %v563_v39 = vsub.f32 %v544_v37, %v532_v41  ;;  %v1249_v37 = vsel %vm1248_vm5, %v1889_v50, %v1231_v17 }
 0x531   :  { %1463 = vpow2.f32 %v1379_v43 }
 0x532   :  { %v565_v51 = vrot.slane %v563_v39, 4 }
 0x534   :  { %566 = vrot.lane.b32.xlu2 %v565_v51, %s1580_s12 }
 0x536   :  { %v1462_v40 = vpop.eup %1461 }
 0x537   :  { %547 = vrot.lane.b32.xlu0 %v1462_v40, %s1580_s12  ;;  %v1464_v45 = vpop.eup %1463 }
 0x538   :  { %v497_v47 = vadd.f32 1.0, %v1464_v45 }
 0x53a   :  { %1465 = vrcp.f32 %v497_v47  ;;  %v524_v56 = vand.u32 2147483648, %v497_v47  ;;  %vm518_vm2 = vweird.f32 %v497_v47  ;;  %v522_v7 = vand.u32 2147483647, %v497_v47 }
 0x53c   :  { %v525_v10 = vor.u32 1.1754944e-38, %v524_v56  ;;  %vm523_vm4 = vcmp.eq.f32.partialorder %v522_v7, 8.507059e+37 }
 0x540   :  { %v1466_v62 = vpop.eup %1465 }
 0x541   :  { %v514_v2 = vmul.f32 %v1466_v62, %v497_v47  ;;  %vm519_vm1 = vweird.f32 %v1466_v62 }
 0x542   :  { %vm520_vm3 = vmor %vm518_vm2, %vm519_vm1  ;;  %vm1252_vm1 = vcmask 1045504  }
 0x543   :  { %v515_v52 = vsub.f32 1.0, %v514_v2 }
 0x545   :  { %v516_v5 = vmul.f32 %v1466_v62, %v515_v52 }
 0x58e   :  { %v567_v59 = vpop.permute.xlu2 %566 }
 0x58f   :  { %v569_v60 = vmul.f32 %v567_v59, %v176_v55 }
 0x591   :  { %v1979_v61 = vadd.f32 %v569_v60, %v1956_v35  ;;  %v517_v35 = vadd.f32 %v1466_v62, %v516_v5 }
 0x593   :  { %v662_v41 = vrot.slane %v1979_v61, 2  ;;  %v521_v9 = vsel %vm520_vm3, %v1466_v62, %v517_v35 }
 0x594   :  { %v526_v3 = vsel %vm523_vm4, %v525_v10, %v521_v9 }
 0x595   :  { %663 = vrot.lane.b32.xlu1 %v662_v41, %s1580_s12 }
 0x59d   :  { %1426 = vperm.xlu1 %1408, %v1425_v48  }
 0x5a9   :  { %v548_v11 = vpop.permute.xlu0 %547 }
 0x5aa   :  { %v550_v14 = vmul.f32 %v548_v11, %v526_v3 }
 0x5ac   :  { %v552_v23 = vrot.slane %v550_v14, 4  ;;  %v557_v16 = vsub.f32 %v550_v14, %v555_v13 }
 0x5ae   :  { %v1989_v19 = vmul.f32 %v552_v23, %v176_v55  ;;  %v559_v22 = vrot.slane %v557_v16, 4 }
 0x5b0   :  { %v561_v27 = vmul.f32 %v559_v22, %v176_v55  ;;  %v1234_v29 = vrot.slane %v1989_v19, 4 }
 0x5b2   :  { %v1995_v39 = vadd.f32 %v561_v27, %v1937_v25  ;;  %v1998_v51 = vsel %vm1250_vm6, %v1249_v37, %v1234_v29 }
 0x5b4   :  { %1380 = vmatmul.msk.f32.vlgmr.msra.gmra.mxu0 %vm55_vm0, %v1995_v39  ;;  %1381 = vmatmul.msk.f32.vlgmr.msra.gmra.mxu1 %vm55_vm0, %v1995_v39 }
 0x5b5   :  { %1094 = vmatpush.msra.mxu0 %v1638_v0  ;;  %1114 = vmatpush.msra.mxu1 %v1730_v21 }
 0x5b7   :  { %1095 = vmatpush.msra.mxu0 %v1643_v1  ;;  %1115 = vmatpush.msra.mxu1 %v1741_v24 }
 0x5b9   :  { %1096 = vmatpush.msra.mxu0 %v1655_v4  ;;  %1116 = vmatpush.msra.mxu1 %v1751_v26 }
 0x5bb   :  { %1097 = vmatpush.msra.mxu0 %v1665_v6  ;;  %1117 = vmatpush.msra.mxu1 %v1762_v28 }
 0x5bd   :  { %1098 = vmatpush.msra.mxu0 %v1675_v8  ;;  %1118 = vmatpush.msra.mxu1 %v1773_v30 }
 0x5bf   :  { %1099 = vmatpush.msra.mxu0 %v1691_v12  ;;  %1119 = vmatpush.msra.mxu1 %v1781_v31 }
 0x5c1   :  { %1100 = vmatpush.msra.mxu0 %v1704_v15  ;;  %1120 = vmatpush.msra.mxu1 %v1790_v32 }
 0x5c3   :  { %1101 = vmatpush.msra.mxu0 %v1717_v18  ;;  %1121 = vmatpush.msra.mxu1 %v1799_v33 }
 0x607   :  { %v664_v0 = vpop.permute.xlu1 %663 }
 0x60f   :  { %v1427_v1 = vpop.permute.xlu1 %1426 }
 0x610   :  { %v1429_v4 = vunpack.i.h.bf16 %v1427_v1  ;;  %v1428_v6 = vunpack.i.l.bf16 %v1427_v1 }
 0x612   :  { %v2021_v8 = vsel %vm141_vm11, %v1429_v4, %v1428_v6  ;;  %v193_v7 = vsel %vm141_vm11, %v1428_v6, %v1429_v4 }
 0x631   :  { %v611_v21 = vpop.f32.mrf.mxu1  ;;  %v591_v15 = vpop.f32.mrf.mxu0 }
 0x632   :  { %v617_v24 = vrot.slane %v611_v21, 2  ;;  %v616_v28 = vrot.slane %v591_v15, 2  ;;  %v1264_v21 = vrot.slane %v1989_v19, 6 }
 0x634   :  { %v621_v12 = vadd.f32 %v617_v24, %v1858_v38  ;;  %v620_v18 = vadd.f32 %v616_v28, %v1865_v44 }
 0x636   :  { %1467 = vtanh.f32 %v621_v12  ;;  %v1382_v30 = vmul.f32 -1.442695, %v620_v18  ;;  %v1383_v5 = vmul.f32 -1.442695, %v621_v12 }
 0x638   :  { %1469 = vpow2.f32 %v1382_v30 }
 0x63c   :  { %v1468_v26 = vpop.eup %1467 }
 0x63d   :  { %668 = vrot.lane.b32.xlu0 %v1468_v26, %s1580_s12  ;;  %v1266_v26 = vrot.slane %v1934_v20, 4  ;;  %v2056_v20 = vadd.f32 %v1915_v53, %v52_v36 }
 0x63e   :  { %v1470_v31 = vpop.eup %1469 }
 0x63f   :  { %v628_v32 = vadd.f32 1.0, %v1470_v31 }
 0x641   :  { %1471 = vrcp.f32 %v628_v32  ;;  %v641_v38 = vand.u32 2147483648, %v628_v32  ;;  %vm635_vm8 = vweird.f32 %v628_v32  ;;  %v639_v47 = vand.u32 2147483647, %v628_v32 }
 0x643   :  { %v642_v59 = vor.u32 1.1754944e-38, %v641_v38  ;;  %vm640_vm10 = vcmp.eq.f32.partialorder %v639_v47, 8.507059e+37 }
 0x647   :  { %v1472_v33 = vpop.eup %1471 }
 0x648   :  { %v631_v25 = vmul.f32 %v1472_v33, %v628_v32  ;;  %vm636_vm7 = vweird.f32 %v1472_v33 }
 0x649   :  { %vm637_vm9 = vmor %vm635_vm8, %vm636_vm7 }
 0x64a   :  { %v632_v40 = vsub.f32 1.0, %v631_v25  ;;  %v2063_v25 = vadd.f32 %v1919_v58, %v51_v42 }
 0x64c   :  { %v633_v43 = vmul.f32 %v1472_v33, %v632_v40 }
 0x64e   :  { %v634_v45 = vadd.f32 %v1472_v33, %v633_v43 }
 0x650   :  { %v638_v55 = vsel %vm637_vm9, %v1472_v33, %v634_v45 }
 0x651   :  { %v643_v44 = vsel %vm640_vm10, %v642_v59, %v638_v55 }
 0x652   :  { %v666_v41 = vmul.f32 %v664_v0, %v643_v44 }
 0x6af   :  { %v669_v60 = vpop.permute.xlu0 %668 }
 0x6b0   :  { %v671_v62 = vmul.f32 %v669_v60, %v643_v44 }
 0x6b2   :  { %673 = vrot.lane.b32.xlu2 %v671_v62, %s1580_s12 }
 0x70c   :  { %v674_v46 = vpop.permute.xlu2 %673 }
 0x70d   :  { %v676_v63 = vadd.f32 %v674_v46, %v666_v41 }
 0x70f   :  { %1473 = vtanh.f32 %v676_v63  ;;  %v695_v2 = vsub.f32 %v676_v63, %v664_v0 }
 0x710   :  { %1475 = vpow2.f32 %v1383_v5 }
 0x711   :  { %v697_v48 = vrot.slane %v695_v2, 6 }
 0x713   :  { %698 = vrot.lane.b32.xlu2 %v697_v48, %s1580_s12 }
 0x715   :  { %v1474_v52 = vpop.eup %1473 }
 0x716   :  { %679 = vrot.lane.b32.xlu0 %v1474_v52, %s1580_s12  ;;  %v1476_v35 = vpop.eup %1475 }
 0x717   :  { %v629_v56 = vadd.f32 1.0, %v1476_v35 }
 0x719   :  { %1477 = vrcp.f32 %v629_v56  ;;  %v656_v17 = vand.u32 2147483648, %v629_v56  ;;  %vm650_vm13 = vweird.f32 %v629_v56  ;;  %v654_v22 = vand.u32 2147483647, %v629_v56 }
 0x71b   :  { %v657_v29 = vor.u32 1.1754944e-38, %v656_v17  ;;  %vm655_vm15 = vcmp.eq.f32.partialorder %v654_v22, 8.507059e+37 }
 0x71f   :  { %v1478_v11 = vpop.eup %1477 }
 0x720   :  { %v646_v13 = vmul.f32 %v1478_v11, %v629_v56  ;;  %vm651_vm12 = vweird.f32 %v1478_v11 }
 0x721   :  { %vm652_vm14 = vmor %vm650_vm13, %vm651_vm12 }
 0x722   :  { %v647_v14 = vsub.f32 1.0, %v646_v13 }
 0x724   :  { %v648_v23 = vmul.f32 %v1478_v11, %v647_v14 }
 0x726   :  { %v649_v16 = vadd.f32 %v1478_v11, %v648_v23 }
 0x728   :  { %v653_v27 = vsel %vm652_vm14, %v1478_v11, %v649_v16 }
 0x729   :  { %v658_v37 = vsel %vm655_vm15, %v657_v29, %v653_v27 }
 0x76d   :  { %v699_v9 = vpop.permute.xlu2 %698 }
 0x76e   :  { %v701_v10 = vmul.f32 %v699_v9, %v193_v7 }
 0x770   :  { %v2031_v3 = vadd.f32 %v701_v10, %v1979_v61  ;;  %v687_v61 = vrot.slane %v1995_v39, 2 }
 0x772   :  { %788 = vrot.lane.b32.xlu1 %v2031_v3, %s1580_s12 }
 0x788   :  { %v680_v0 = vpop.permute.xlu0 %679 }
 0x789   :  { %v682_v1 = vmul.f32 %v680_v0, %v658_v37 }
 0x78b   :  { %v684_v4 = vrot.slane %v682_v1, 6  ;;  %v689_v6 = vsub.f32 %v682_v1, %v687_v61 }
 0x78d   :  { %v686_v24 = vmul.f32 %v684_v4, %v193_v7  ;;  %v691_v12 = vrot.slane %v689_v6, 6 }
 0x78f   :  { %v693_v15 = vmul.f32 %v691_v12, %v193_v7  ;;  %v1237_v28 = vrot.slane %v686_v24, 2  ;;  %v1274_v18 = vsel %vm1248_vm5, %v686_v24, %v1264_v21 }
 0x790   :  { %v2040_v30 = vsel %vm1250_vm6, %v1274_v18, %v1266_v26 }
 0x791   :  { %v2043_v31 = vadd.f32 %v693_v15, %v1995_v39  ;;  %v2047_v32 = vsel %vm1252_vm1, %v1998_v51, %v1237_v28 }
 0x793   :  { %1384 = vmatmul.msk.f32.vlgmr.msrb.gmra.mxu2 %vm55_vm0, %v2043_v31  ;;  %1385 = vmatmul.msk.f32.vlgmr.msrb.gmra.mxu3 %vm55_vm0, %v2043_v31 }
 0x7e4   :  { %v789_v46 = vpop.permute.xlu1 %788 }
 0x816   :  { %v743_v19 = vpop.f32.mrf.mxu3  ;;  %v723_v51 = vpop.f32.mrf.mxu2 }
 0x817   :  { %v747_v33 = vadd.f32 %v743_v19, %v2056_v20  ;;  %v746_v40 = vadd.f32 %v723_v51, %v2063_v25 }
 0x819   :  { %1479 = vtanh.f32 %v747_v33  ;;  %v1386_v43 = vmul.f32 -1.442695, %v746_v40  ;;  %v1387_v35 = vmul.f32 -1.442695, %v747_v33 }
 0x81b   :  { %1481 = vpow2.f32 %v1386_v43 }
 0x81f   :  { %v1480_v39 = vpop.eup %1479 }
 0x820   :  { %793 = vrot.lane.b32.xlu0 %v1480_v39, %s1580_s12 }
 0x821   :  { %v1482_v45 = vpop.eup %1481 }
 0x822   :  { %v754_v36 = vadd.f32 1.0, %v1482_v45 }
 0x824   :  { %1483 = vrcp.f32 %v754_v36  ;;  %v767_v60 = vand.u32 2147483648, %v754_v36  ;;  %vm761_vm3 = vweird.f32 %v754_v36  ;;  %v765_v44 = vand.u32 2147483647, %v754_v36 }
 0x826   :  { %v768_v42 = vor.u32 1.1754944e-38, %v767_v60  ;;  %vm766_vm7 = vcmp.eq.f32.partialorder %v765_v44, 8.507059e+37 }
 0x82a   :  { %v1484_v53 = vpop.eup %1483 }
 0x82b   :  { %v757_v38 = vmul.f32 %v1484_v53, %v754_v36  ;;  %vm762_vm2 = vweird.f32 %v1484_v53 }
 0x82c   :  { %vm763_vm4 = vmor %vm761_vm3, %vm762_vm2 }
 0x82d   :  { %v758_v47 = vsub.f32 1.0, %v757_v38 }
 0x82f   :  { %v759_v55 = vmul.f32 %v1484_v53, %v758_v47 }
 0x831   :  { %v760_v59 = vadd.f32 %v1484_v53, %v759_v55 }
 0x833   :  { %v764_v34 = vsel %vm763_vm4, %v1484_v53, %v760_v59 }
 0x834   :  { %v769_v62 = vsel %vm766_vm7, %v768_v42, %v764_v34 }
 0x835   :  { %v791_v63 = vmul.f32 %v789_v46, %v769_v62 }
 0x892   :  { %v794_v58 = vpop.permute.xlu0 %793 }
 0x893   :  { %v796_v41 = vmul.f32 %v794_v58, %v769_v62 }
 0x895   :  { %798 = vrot.lane.b32.xlu2 %v796_v41, %s1580_s12 }
 0x8ef   :  { %v799_v2 = vpop.permute.xlu2 %798 }
 0x8f0   :  { %v801_v48 = vadd.f32 %v799_v2, %v791_v63 }
 0x8f2   :  { %1485 = vtanh.f32 %v801_v48  ;;  %v812_v52 = vsub.f32 %v801_v48, %v789_v46 }
 0x8f3   :  { %1487 = vpow2.f32 %v1387_v35 }
 0x8f4   :  { %814 = vrot.lane.b32.xlu1 %v812_v52, %s1580_s12 }
 0x8f8   :  { %v1486_v5 = vpop.eup %1485 }
 0x8f9   :  { %804 = vrot.lane.b32.xlu0 %v1486_v5, %s1580_s12  ;;  %v1488_v56 = vpop.eup %1487 }
 0x8fa   :  { %v755_v7 = vadd.f32 1.0, %v1488_v56 }
 0x8fc   :  { %1489 = vrcp.f32 %v755_v7  ;;  %v782_v23 = vand.u32 2147483648, %v755_v7  ;;  %vm776_vm9 = vweird.f32 %v755_v7  ;;  %v780_v17 = vand.u32 2147483647, %v755_v7 }
 0x8fe   :  { %v783_v37 = vor.u32 1.1754944e-38, %v782_v23  ;;  %vm781_vm12 = vcmp.eq.f32.partialorder %v780_v17, 8.507059e+37 }
 0x902   :  { %v1490_v9 = vpop.eup %1489 }
 0x903   :  { %v772_v10 = vmul.f32 %v1490_v9, %v755_v7  ;;  %vm777_vm8 = vweird.f32 %v1490_v9 }
 0x904   :  { %vm778_vm10 = vmor %vm776_vm9, %vm777_vm8 }
 0x905   :  { %v773_v11 = vsub.f32 1.0, %v772_v10 }
 0x907   :  { %v774_v13 = vmul.f32 %v1490_v9, %v773_v11 }
 0x909   :  { %v775_v14 = vadd.f32 %v1490_v9, %v774_v13 }
 0x90b   :  { %v779_v27 = vsel %vm778_vm10, %v1490_v9, %v775_v14 }
 0x90c   :  { %v784_v0 = vsel %vm781_vm12, %v783_v37, %v779_v27 }
 0x966   :  { %v815_v16 = vpop.permute.xlu1 %814 }
 0x967   :  { %v817_v22 = vmul.f32 %v815_v16, %v2021_v8 }
 0x969   :  { %v2071_v29 = vadd.f32 %v817_v22, %v2031_v3 }
 0x96b   :  { %v805_v61 = vpop.permute.xlu0 %804  ;;  %v910_v1 = vrot.slane %v2071_v29, 6 }
 0x96c   :  { %v807_v4 = vmul.f32 %v805_v61, %v784_v0 }
 0x96d   :  { %911 = vrot.lane.b32.xlu0 %v910_v1, %s1580_s12 }
 0x96e   :  { %v2076_v6 = vmul.f32 %v807_v4, %v2021_v8  ;;  %v809_v21 = vsub.f32 %v807_v4, %v2043_v31 }
 0x970   :  { %v810_v24 = vmul.f32 %v809_v21, %v2021_v8 }
 0x972   :  { %v2081_v12 = vadd.f32 %v810_v24, %v2043_v31 }
 0x974   :  { %1388 = vmatmul.msk.f32.vlgmr.msrb.gmra.mxu0 %vm55_vm0, %v2081_v12  ;;  %1389 = vmatmul.msk.f32.vlgmr.msrb.gmra.mxu1 %vm55_vm0, %v2081_v12  ;;  %v935_v17 = vrot.slane %v2081_v12, 6 }
 0x9df   :  { %v912_v34 = vpop.permute.xlu0 %911 }
 0x9f1   :  { %v859_v3 = vpop.f32.mrf.mxu1  ;;  %v839_v18 = vpop.f32.mrf.mxu0 }
 0x9f2   :  { %v865_v26 = vrot.slane %v859_v3, 6  ;;  %v864_v19 = vrot.slane %v839_v18, 6 }
 0x9f4   :  { %v869_v15 = vadd.f32 %v865_v26, %v2056_v20  ;;  %v868_v8 = vadd.f32 %v864_v19, %v2063_v25 }
 0x9f6   :  { %1491 = vtanh.f32 %v869_v15  ;;  %v1390_v31 = vmul.f32 -1.442695, %v868_v8  ;;  %v1391_v2 = vmul.f32 -1.442695, %v869_v15 }
 0x9f8   :  { %1493 = vpow2.f32 %v1390_v31 }
 0x9fc   :  { %v1492_v28 = vpop.eup %1491 }
 0x9fd   :  { %916 = vrot.lane.b32.xlu2 %v1492_v28, %s1580_s12 }
 0x9fe   :  { %v1494_v33 = vpop.eup %1493 }
 0x9ff   :  { %v876_v39 = vadd.f32 1.0, %v1494_v33 }
 0xa01   :  { %1495 = vrcp.f32 %v876_v39  ;;  %v889_v53 = vand.u32 2147483648, %v876_v39  ;;  %vm883_vm14 = vweird.f32 %v876_v39  ;;  %v887_v38 = vand.u32 2147483647, %v876_v39 }
 0xa03   :  { %v890_v55 = vor.u32 1.1754944e-38, %v889_v53  ;;  %vm888_vm2 = vcmp.eq.f32.partialorder %v887_v38, 8.507059e+37 }
 0xa07   :  { %v1496_v51 = vpop.eup %1495 }
 0xa08   :  { %v879_v40 = vmul.f32 %v1496_v51, %v876_v39  ;;  %vm884_vm13 = vweird.f32 %v1496_v51 }
 0xa09   :  { %vm885_vm15 = vmor %vm883_vm14, %vm884_vm13 }
 0xa0a   :  { %v880_v43 = vsub.f32 1.0, %v879_v40 }
 0xa0c   :  { %v881_v45 = vmul.f32 %v1496_v51, %v880_v43 }
 0xa0e   :  { %v882_v36 = vadd.f32 %v1496_v51, %v881_v45 }
 0xa10   :  { %v886_v47 = vsel %vm885_vm15, %v1496_v51, %v882_v36 }
 0xa11   :  { %v891_v60 = vsel %vm888_vm2, %v890_v55, %v886_v47 }
 0xa12   :  { %v914_v42 = vmul.f32 %v912_v34, %v891_v60 }
 0xa57   :  { %v917_v59 = vpop.permute.xlu2 %916 }
 0xa58   :  { %v919_v44 = vmul.f32 %v917_v59, %v891_v60 }
 0xa5a   :  { %921 = vrot.lane.b32.xlu1 %v919_v44, %s1580_s12 }
 0xacc   :  { %v922_v58 = vpop.permute.xlu1 %921 }
 0xacd   :  { %v924_v62 = vadd.f32 %v922_v58, %v914_v42 }
 0xacf   :  { %1497 = vtanh.f32 %v924_v62  ;;  %v943_v41 = vsub.f32 %v924_v62, %v912_v34 }
 0xad0   :  { %1499 = vpow2.f32 %v1391_v2 }
 0xad1   :  { %v945_v46 = vrot.slane %v943_v41, 2 }
 0xad3   :  { %946 = vrot.lane.b32.xlu0 %v945_v46, %s1580_s12 }
 0xad5   :  { %v1498_v63 = vpop.eup %1497 }
 0xad6   :  { %927 = vrot.lane.b32.xlu2 %v1498_v63, %s1580_s12  ;;  %v1500_v48 = vpop.eup %1499 }
 0xad7   :  { %v877_v52 = vadd.f32 1.0, %v1500_v48 }
 0xad9   :  { %1501 = vrcp.f32 %v877_v52  ;;  %v904_v10 = vand.u32 2147483648, %v877_v52  ;;  %vm898_vm4 = vweird.f32 %v877_v52  ;;  %v902_v11 = vand.u32 2147483647, %v877_v52 }
 0xadb   :  { %v905_v14 = vor.u32 1.1754944e-38, %v904_v10  ;;  %vm903_vm8 = vcmp.eq.f32.partialorder %v902_v11, 8.507059e+37 }
 0xadf   :  { %v1502_v5 = vpop.eup %1501 }
 0xae0   :  { %v894_v35 = vmul.f32 %v1502_v5, %v877_v52  ;;  %vm899_vm3 = vweird.f32 %v1502_v5 }
 0xae1   :  { %vm900_vm7 = vmor %vm898_vm4, %vm899_vm3 }
 0xae2   :  { %v895_v56 = vsub.f32 1.0, %v894_v35 }
 0xae4   :  { %v896_v7 = vmul.f32 %v1502_v5, %v895_v56 }
 0xae6   :  { %v897_v9 = vadd.f32 %v1502_v5, %v896_v7 }
 0xae8   :  { %v901_v13 = vsel %vm900_vm7, %v1502_v5, %v897_v9 }
 0xae9   :  { %v906_v23 = vsel %vm903_vm8, %v905_v14, %v901_v13 }
 0xb30   :  { %v928_v16 = vpop.permute.xlu2 %927 }
 0xb31   :  { %v930_v22 = vmul.f32 %v928_v16, %v906_v23 }
 0xb33   :  { %v932_v27 = vrot.slane %v930_v22, 2  ;;  %v937_v37 = vsub.f32 %v930_v22, %v935_v17 }
 0xb35   :  { %v2095_v0 = vmul.f32 %v932_v27, %v1970_v54  ;;  %v939_v61 = vrot.slane %v937_v37, 2 }
 0xb37   :  { %v941_v1 = vmul.f32 %v939_v61, %v1970_v54  ;;  %v1240_v4 = vrot.slane %v2095_v0, 6 }
 0xb39   :  { %v2100_v21 = vadd.f32 %v941_v1, %v2081_v12  ;;  %v2104_v24 = vsel %vm1248_vm5, %v2076_v6, %v1240_v4 }
 0xb3b   :  { %1392 = vmatmul.msk.f32.vlgmr.msra.gmra.mxu2 %vm55_vm0, %v2100_v21  ;;  %1393 = vmatmul.msk.f32.vlgmr.msra.gmra.mxu3 %vm55_vm0, %v2100_v21  ;;  %v1067_v1 = vrot.slane %v2100_v21, 4 }
 0xb45   :  { %v947_v3 = vpop.permute.xlu0 %946 }
 0xb46   :  { %v949_v26 = vmul.f32 %v947_v3, %v1970_v54 }
 0xb48   :  { %v950_v15 = vadd.f32 %v949_v26, %v2071_v29 }
 0xb4a   :  { %v1042_v28 = vrot.slane %v950_v15, 4 }
 0xb4c   :  { %1043 = vrot.lane.b32.xlu2 %v1042_v28, %s1580_s12 }
 0xba6   :  { %v1044_v42 = vpop.permute.xlu2 %1043 }
 0xbbe   :  { %v991_v12 = vpop.f32.mrf.mxu3  ;;  %v971_v31 = vpop.f32.mrf.mxu2 }
 0xbbf   :  { %v997_v18 = vrot.slane %v991_v12, 4  ;;  %v996_v33 = vrot.slane %v971_v31, 4 }
 0xbc1   :  { %v1001_v19 = vadd.f32 %v997_v18, %v2056_v20  ;;  %v1000_v39 = vadd.f32 %v996_v33, %v2063_v25 }
 0xbc3   :  { %1503 = vtanh.f32 %v1001_v19  ;;  %v1394_v51 = vmul.f32 -1.442695, %v1000_v39  ;;  %v1395_v48 = vmul.f32 -1.442695, %v1001_v19 }
 0xbc5   :  { %1505 = vpow2.f32 %v1394_v51 }
 0xbc9   :  { %v1504_v8 = vpop.eup %1503 }
 0xbca   :  { %1048 = vrot.lane.b32.xlu1 %v1504_v8, %s1580_s12 }
 0xbcb   :  { %v1506_v54 = vpop.eup %1505 }
 0xbcc   :  { %v1008_v40 = vadd.f32 1.0, %v1506_v54 }
 0xbce   :  { %1507 = vrcp.f32 %v1008_v40  ;;  %v1021_v38 = vand.u32 2147483648, %v1008_v40  ;;  %vm1015_vm10 = vweird.f32 %v1008_v40  ;;  %v1019_v47 = vand.u32 2147483647, %v1008_v40 }
 0xbd0   :  { %v1022_v59 = vor.u32 1.1754944e-38, %v1021_v38  ;;  %vm1020_vm13 = vcmp.eq.f32.partialorder %v1019_v47, 8.507059e+37 }
 0xbd4   :  { %v1508_v29 = vpop.eup %1507 }
 0xbd5   :  { %v1011_v43 = vmul.f32 %v1508_v29, %v1008_v40  ;;  %vm1016_vm9 = vweird.f32 %v1508_v29 }
 0xbd6   :  { %vm1017_vm12 = vmor %vm1015_vm10, %vm1016_vm9 }
 0xbd7   :  { %v1012_v45 = vsub.f32 1.0, %v1011_v43 }
 0xbd9   :  { %v1013_v36 = vmul.f32 %v1508_v29, %v1012_v45 }
 0xbdb   :  { %v1014_v53 = vadd.f32 %v1508_v29, %v1013_v36 }
 0xbdd   :  { %v1018_v55 = vsel %vm1017_vm12, %v1508_v29, %v1014_v53 }
 0xbde   :  { %v1023_v44 = vsel %vm1020_vm13, %v1022_v59, %v1018_v55 }
 0xbdf   :  { %v1046_v58 = vmul.f32 %v1044_v42, %v1023_v44 }
 0xc3c   :  { %v1049_v60 = vpop.permute.xlu1 %1048 }
 0xc3d   :  { %v1051_v34 = vmul.f32 %v1049_v60, %v1023_v44 }
 0xc3f   :  { %1053 = vrot.lane.b32.xlu0 %v1051_v34, %s1580_s12  ;;  %v1286_v34 = vld [vmem:[%s2215_s5 + $0x38] sm:$0xff] }
 0xc40   :  { %1305 = vmatpush.msrb.mxu2 %v1286_v34 }
 0xcb1   :  { %v1054_v62 = vpop.permute.xlu0 %1053 }
 0xcb2   :  { %v1056_v41 = vadd.f32 %v1054_v62, %v1046_v58 }
 0xcb4   :  { %1509 = vtanh.f32 %v1056_v41  ;;  %v1075_v46 = vsub.f32 %v1056_v41, %v1044_v42 }
 0xcb5   :  { %1511 = vpow2.f32 %v1395_v48 }
 0xcb6   :  { %v1077_v63 = vrot.slane %v1075_v46, 4 }
 0xcb8   :  { %1078 = vrot.lane.b32.xlu2 %v1077_v63, %s1580_s12 }
 0xcba   :  { %v1510_v2 = vpop.eup %1509 }
 0xcbb   :  { %1059 = vrot.lane.b32.xlu1 %v1510_v2, %s1580_s12  ;;  %v1512_v52 = vpop.eup %1511 }
 0xcbc   :  { %v1009_v5 = vadd.f32 1.0, %v1512_v52 }
 0xcbe   :  { %1513 = vrcp.f32 %v1009_v5  ;;  %v1036_v16 = vand.u32 2147483648, %v1009_v5  ;;  %vm1030_vm15 = vweird.f32 %v1009_v5  ;;  %v1034_v17 = vand.u32 2147483647, %v1009_v5 }
 0xcc0   :  { %v1037_v27 = vor.u32 1.1754944e-38, %v1036_v16  ;;  %vm1035_vm3 = vcmp.eq.f32.partialorder %v1034_v17, 8.507059e+37 }
 0xcc4   :  { %v1514_v9 = vpop.eup %1513 }
 0xcc5   :  { %v1026_v11 = vmul.f32 %v1514_v9, %v1009_v5  ;;  %vm1031_vm14 = vweird.f32 %v1514_v9  ;;  %v1285_v5 = vld [vmem:[%s2215_s5 + $0x30] sm:$0xff] }
 0xcc6   :  { %vm1032_vm2 = vmor %vm1030_vm15, %vm1031_vm14  ;;  %1306 = vmatpush.msrb.mxu2 %v1285_v5 }
 0xcc7   :  { %v1027_v13 = vsub.f32 1.0, %v1026_v11  ;;  %v1281_v11 = vld [vmem:[%s2215_s5 + $0x10] sm:$0xff] }
 0xcc9   :  { %v1028_v14 = vmul.f32 %v1514_v9, %v1027_v13  ;;  %v1280_v13 = vld [vmem:[%s2215_s5 + $0x8] sm:$0xff] }
 0xccb   :  { %v1029_v23 = vadd.f32 %v1514_v9, %v1028_v14  ;;  %v1279_v14 = vld [vmem:[%s2215_s5] sm:$0xff] }
 0xccd   :  { %v1033_v22 = vsel %vm1032_vm2, %v1514_v9, %v1029_v23  ;;  %v1283_v9 = vld [vmem:[%s2215_s5 + $0x20] sm:$0xff] }
 0xcce   :  { %v1038_v37 = vsel %vm1035_vm3, %v1037_v27, %v1033_v22 }
 0xd12   :  { %v1079_v35 = vpop.permute.xlu2 %1078 }
 0xd13   :  { %v1081_v56 = vmul.f32 %v1079_v35, %v1930_v57 }
 0xd15   :  { %v2120_v7 = vadd.f32 %v1081_v56, %v950_v15  ;;  %v1284_v56 = vld [vmem:[%s2215_s5 + $0x28] sm:$0xff] }
 0xd16   :  { %1307 = vmatpush.msrb.mxu2 %v1284_v56 }
 0xd17   :  { %v1174_v10 = vrot.slane %v2120_v7, 2 }
 0xd18   :  { %1308 = vmatpush.msrb.mxu2 %v1283_v9 }
 0xd19   :  { %1175 = vrot.lane.b32.xlu1 %v1174_v10, %s1580_s12  ;;  %v1282_v10 = vld [vmem:[%s2215_s5 + $0x18] sm:$0xff]  ;;  %s1582_s5 = smov 96  }
 0xd1a   :  { %1309 = vmatpush.msrb.mxu2 %v1282_v10 }
 0xd1c   :  { %1310 = vmatpush.msrb.mxu2 %v1281_v11 }
 0xd1e   :  { %1311 = vmatpush.msrb.mxu2 %v1280_v13 }
 0xd20   :  { %1312 = vmatpush.msrb.mxu2 %v1279_v14 }
 0xd2d   :  { %v1060_v61 = vpop.permute.xlu1 %1059 }
 0xd2e   :  { %v1062_v4 = vmul.f32 %v1060_v61, %v1038_v37 }
 0xd30   :  { %v1064_v3 = vrot.slane %v1062_v4, 4  ;;  %v1069_v26 = vsub.f32 %v1062_v4, %v1067_v1 }
 0xd32   :  { %v2126_v15 = vmul.f32 %v1064_v3, %v1930_v57  ;;  %v1071_v28 = vrot.slane %v1069_v26, 4 }
 0xd34   :  { %v1073_v12 = vmul.f32 %v1071_v28, %v1930_v57  ;;  %v1243_v18 = vrot.slane %v2126_v15, 4 }
 0xd36   :  { %v2131_v19 = vadd.f32 %v1073_v12, %v2100_v21  ;;  %v2135_v8 = vsel %vm1250_vm6, %v2104_v24, %v1243_v18 }
 0xd38   :  { %1396 = vmatmul.msk.f32.vlgmr.msra.gmra.mxu0 %vm55_vm0, %v2131_v19  ;;  %1397 = vmatmul.msk.f32.vlgmr.msra.gmra.mxu1 %vm55_vm0, %v2131_v19 }
 0xd8b   :  { %v1176_v42 = vpop.permute.xlu1 %1175 }
 0xdb5   :  { %v1123_v31 = vpop.f32.mrf.mxu1  ;;  %v1103_v21 = vpop.f32.mrf.mxu0 }
 0xdb6   :  { %v1129_v33 = vrot.slane %v1123_v31, 2  ;;  %v1128_v51 = vrot.slane %v1103_v21, 2  ;;  %v1199_v31 = vrot.slane %v2131_v19, 2  ;;  %v1257_v21 = vrot.slane %v2126_v15, 6 }
 0xdb8   :  { %v1133_v39 = vadd.f32 %v1129_v33, %v2056_v20  ;;  %v1132_v54 = vadd.f32 %v1128_v51, %v2063_v25 }
 0xdba   :  { %1515 = vtanh.f32 %v1133_v39  ;;  %v1398_v24 = vmul.f32 -1.442695, %v1132_v54  ;;  %v1399_v48 = vmul.f32 -1.442695, %v1133_v39 }
 0xdbc   :  { %1517 = vpow2.f32 %v1398_v24  ;;  %v1259_v24 = vrot.slane %v2095_v0, 4 }
 0xdc0   :  { %v1516_v57 = vpop.eup %1515 }
 0xdc1   :  { %1180 = vrot.lane.b32.xlu0 %v1516_v57, %s1580_s12 }
 0xdc2   :  { %v1518_v40 = vpop.eup %1517 }
 0xdc3   :  { %v1140_v29 = vadd.f32 1.0, %v1518_v40  ;;  %v1269_v40 = vrot.slane %v1889_v50, 2 }
 0xdc5   :  { %1519 = vrcp.f32 %v1140_v29  ;;  %v1153_v20 = vand.u32 2147483648, %v1140_v29  ;;  %vm1147_vm7 = vweird.f32 %v1140_v29  ;;  %v1151_v47 = vand.u32 2147483647, %v1140_v29 }
 0xdc6   :  { %v1276_v0 = vsel %vm1252_vm1, %v2040_v30, %v1269_v40 }
 0xdc7   :  { %v1154_v59 = vor.u32 1.1754944e-38, %v1153_v20  ;;  %vm1152_vm9 = vcmp.eq.f32.partialorder %v1151_v47, 8.507059e+37  ;;  %v1430_v47 = vld [vmem:[%s2216_s6] ss:$0 sm:$0xff] }
 0xdcb   :  { %v1520_v43 = vpop.eup %1519 }
 0xdcc   :  { %v1143_v45 = vmul.f32 %v1520_v43, %v1140_v29  ;;  %vm1148_vm4 = vweird.f32 %v1520_v43 }
 0xdcd   :  { %vm1149_vm8 = vmor %vm1147_vm7, %vm1148_vm4 }
 0xdce   :  { %v1144_v36 = vsub.f32 1.0, %v1143_v45 }
 0xdd0   :  { %v1145_v53 = vmul.f32 %v1520_v43, %v1144_v36 }
 0xdd2   :  { %v1146_v38 = vadd.f32 %v1520_v43, %v1145_v53 }
 0xdd4   :  { %v1150_v55 = vsel %vm1149_vm8, %v1520_v43, %v1146_v38 }
 0xdd5   :  { %v1155_v25 = vsel %vm1152_vm9, %v1154_v59, %v1150_v55 }
 0xdd6   :  { %v1178_v58 = vmul.f32 %v1176_v42, %v1155_v25 }
 0xe33   :  { %v1181_v60 = vpop.permute.xlu0 %1180 }
 0xe34   :  { %v1183_v44 = vmul.f32 %v1181_v60, %v1155_v25 }
 0xe36   :  { %1185 = vrot.lane.b32.xlu2 %v1183_v44, %s1580_s12 }
 0xe90   :  { %v1186_v62 = vpop.permute.xlu2 %1185 }
 0xe91   :  { %v1188_v41 = vadd.f32 %v1186_v62, %v1178_v58 }
 0xe93   :  { %1521 = vtanh.f32 %v1188_v41  ;;  %v1207_v46 = vsub.f32 %v1188_v41, %v1176_v42 }
 0xe94   :  { %1523 = vpow2.f32 %v1399_v48 }
 0xe95   :  { %v1209_v63 = vrot.slane %v1207_v46, 6 }
 0xe97   :  { %1210 = vrot.lane.b32.xlu1 %v1209_v63, %s1580_s12 }
 0xe99   :  { %v1522_v2 = vpop.eup %1521 }
 0xe9a   :  { %1191 = vrot.lane.b32.xlu0 %v1522_v2, %s1580_s12  ;;  %v1524_v52 = vpop.eup %1523  ;;  %s1584_s12 = smov [#allocation4]  }
 0xe9b   :  { %v1141_v35 = vadd.f32 1.0, %v1524_v52  ;;  %s1340_s3 = sshll.u32 %s1584_s12, 4  ;;  %s1341_s3 = int_to_ptr.vmem [resolvable:$true] %s1340_s3 }
 0xe9d   :  { %1525 = vrcp.f32 %v1141_v35  ;;  %v1168_v37 = vand.u32 2147483648, %v1141_v35  ;;  %vm1162_vm12 = vweird.f32 %v1141_v35  ;;  %v1166_v61 = vand.u32 2147483647, %v1141_v35 }
 0xe9f   :  { %v1169_v26 = vor.u32 1.1754944e-38, %v1168_v37  ;;  %vm1167_vm14 = vcmp.eq.f32.partialorder %v1166_v61, 8.507059e+37 }
 0xea3   :  { %v1526_v23 = vpop.eup %1525 }
 0xea4   :  { %v1158_v16 = vmul.f32 %v1526_v23, %v1141_v35  ;;  %vm1163_vm10 = vweird.f32 %v1526_v23 }
 0xea5   :  { %vm1164_vm13 = vmor %vm1162_vm12, %vm1163_vm10 }
 0xea6   :  { %v1159_v17 = vsub.f32 1.0, %v1158_v16 }
 0xea8   :  { %v1160_v22 = vmul.f32 %v1526_v23, %v1159_v17 }
 0xeaa   :  { %v1161_v27 = vadd.f32 %v1526_v23, %v1160_v22 }
 0xeac   :  { %v1165_v4 = vsel %vm1164_vm13, %v1526_v23, %v1161_v27 }
 0xead   :  { %v1170_v12 = vsel %vm1167_vm14, %v1169_v26, %v1165_v4 }
 0xf09   :  { %v1211_v1 = vpop.permute.xlu1 %1210 }
 0xf0a   :  { %v1213_v3 = vmul.f32 %v1211_v1, %v1887_v49 }
 0xf0c   :  { %v1214_v28 = vadd.f32 %v1213_v3, %v2120_v7  ;;  %v1192_v18 = vpop.permute.xlu0 %1191  ;;  %v1262_v7 = vrot.slane %v2076_v6, 2 }
 0xf0d   :  { %v1194_v33 = vmul.f32 %v1192_v18, %v1170_v12 }
 0xf0e   :  { %1224 = vrot.lane.b32.xlu0 %v1214_v28, %s1582_s5 }
 0xf0f   :  { %v1196_v39 = vrot.slane %v1194_v33, 6  ;;  %v1201_v57 = vsub.f32 %v1194_v33, %v1199_v31 }
 0xf11   :  { %v1198_v51 = vmul.f32 %v1196_v39, %v1887_v49  ;;  %v1203_v54 = vrot.slane %v1201_v57, 6 }
 0xf13   :  { %v1205_v29 = vmul.f32 %v1203_v54, %v1887_v49  ;;  %v1246_v43 = vrot.slane %v1198_v51, 2  ;;  %v1271_v45 = vsel %vm1248_vm5, %v1198_v51, %v1257_v21  ;;  %vm1221_vm5 = vcmask 254976  }
 0xf14   :  { %v1272_v36 = vsel %vm1250_vm6, %v1271_v45, %v1259_v24 }
 0xf15   :  { %v1206_v53 = vadd.f32 %v1205_v29, %v2131_v19  ;;  %v1273_v15 = vsel %vm1252_vm1, %v1272_v36, %v1262_v7  ;;  %v1256_v38 = vsel %vm1252_vm1, %v2135_v8, %v1246_v43 }
 0xf16   :  { %v1277_v50 = vsel %vm141_vm11, %v2047_v32, %v1273_v15  ;;  %v1278_v49 = vsel %vm141_vm11, %v1256_v38, %v1276_v0 }
 0xf17   :  { %1216 = vrot.lane.b32.xlu2 %v1206_v53, %s1582_s5  ;;  %1400 = vmatmul.msk.f32.vlgmr.msrb.gmra.mxu2 %vm55_vm0, %v1277_v50 }
 0xf1f   :  { %1401 = vmatmul.msk.f32.gmra.mxu2 %vm55_vm0, %v1278_v49 }
 0xf71   :  { %v1217_v6 = vpop.permute.xlu2 %1216 }
 0xf72   :  { %v1219_v19 = vadd.f32 %v1217_v6, %v1206_v53 }
 0xf74   :  { %v1220_v30 = vmul.f32 0.5, %v1219_v19 }
 0xf76   :  { %1222 = vst.msk [vmem:[#allocation2] sm:$0x3] %vm1221_vm5, %v1220_v30 }
 0xf77   :  { %1334 = dma.vmem_to_hbm [thread:$0]  %s1330_s30, 32, %s1332_s11, [#allocation3]  }
 0xf80   :  { %v1225_v32 = vpop.permute.xlu0 %1224 }
 0xf81   :  { %v1227_v8 = vadd.f32 %v1225_v32, %v1214_v28 }
 0xf83   :  { %v1228_v20 = vmul.f32 0.5, %v1227_v8 }
 0xf85   :  { %1229 = vst.msk [vmem:[#allocation4] sm:$0x3] %vm1221_vm5, %v1228_v20 }
 0xf86   :  { %1345 = dma.vmem_to_hbm [thread:$0]  %s1341_s3, 32, %s1343_s15, [#allocation5]  }
 0xf9a   :  { %v1314_v55 = vpop.f32.mrf.mxu2 }
 0xf9b   :  { %v1315_v59 = vadd.f32 %v1430_v47, %v1314_v55 }
 0xf9d   :  { %1320 = vst.msk [vmem:[%s2217_s7] sm:$0xff] %vm141_vm11, %v1315_v59 }
 0xfa2   :  { %v1317_v60 = vpop.f32.mrf.mxu2 }
 0xfa3   :  { %v1318_v25 = vadd.f32 %v1430_v47, %v1317_v60 }
 0xfa5   :  { %1321 = vst.msk [vmem:[%s2217_s7 + $0x8] sm:$0xff] %vm141_vm11, %v1318_v25 }
 0xfa6   :  { %1575 = dma.done.wait [#allocation3], 32  }
 0xfa7   :  { %1576 = vsyncadd [#allocation3], 4294967264 }
 0xfa8   :  { %1577 = dma.done.wait [#allocation5], 32  }
 0xfa9   :  { %1578 = vsyncadd [#allocation5], 4294967264 }
 0xfaa   :  { %1356 = vsyncpa [#allocation3], 1 }
 0xfab   :  { %1357 = vsyncpa [#allocation5], 1 }

</bundles_post_ra>
